<compile_context>
chip_gen: v6e
topology: v6e:2x2x1
jax: 0.10.0
libtpu: 0.0.40
codegen_flags: <defaults>
</compile_context>

<pallas_src>
import functools
import math

import jax
import jax.numpy as jnp
from jax.experimental import pallas as pl
from jax.experimental.pallas import tpu as pltpu

# ----------------------------- config ---------------------------------------
IMG = 16          # image height/width
PATCH = 4         # patch size (stands in for DINOv2's 14)
IN_CH = 3         # RGB
EMBED = 32        # embed dim (stands in for 768)
DEPTH = 2         # transformer blocks
HEADS = 4
HEAD_DIM = EMBED // HEADS
MLP_HIDDEN = EMBED * 4
NUM_LABELS = 14
LORA_R = 4
LORA_ALPHA = 8
LORA_SCALE = LORA_ALPHA / LORA_R   # same scaling (=2.0) as r=16, alpha=32
LN_EPS = 1e-6

NUM_PATCHES = (IMG // PATCH) ** 2
SEQ = NUM_PATCHES + 1              # + CLS token


def _gelu_tanh(x):
    # tanh-approx GELU (torch nn.GELU uses erf; difference is ~1e-3)
    return 0.5 * x * (1.0 + jnp.tanh(
        0.7978845608028654 * (x + 0.044715 * x * x * x)))


# ----------------------------- kernels --------------------------------------
def _matmul_bias_kernel(x_ref, w_ref, b_ref, o_ref):
    acc = jnp.dot(x_ref[...].astype(jnp.bfloat16), w_ref[...],
                  preferred_element_type=jnp.float32)
    o_ref[...] = (acc + b_ref[...]).astype(o_ref.dtype)


def matmul_bias(x, w, b):
    """x:(M,K) @ w:(K,N) + b:(1,N) -> (M,N).  w is bf16, accum f32."""
    M, K = x.shape
    N = w.shape[1]
    return pl.pallas_call(
        _matmul_bias_kernel,
        out_shape=jax.ShapeDtypeStruct((M, N), x.dtype),
        grid=(1,),
        in_specs=[
            pl.BlockSpec((M, K), lambda i: (0, 0)),
            pl.BlockSpec((K, N), lambda i: (0, 0)),
            pl.BlockSpec((1, N), lambda i: (0, 0)),
        ],
        out_specs=pl.BlockSpec((M, N), lambda i: (0, 0)),
    )(x, w, b)


def _ln_matmul_bias_kernel(x_ref, g_ref, b_ref, w_ref, bias_ref, o_ref):
    """Fused LayerNorm (f32 stats) + matmul (bf16 operands, f32 acc) + bias."""
    x = x_ref[...].astype(jnp.float32)
    mean = jnp.mean(x, axis=-1, keepdims=True)
    var = jnp.mean(jnp.square(x - mean), axis=-1, keepdims=True)
    h = (x - mean) * jax.lax.rsqrt(var + LN_EPS)
    h = h * g_ref[...] + b_ref[...]
    acc = jnp.dot(h.astype(jnp.bfloat16), w_ref[...],
                  preferred_element_type=jnp.float32)
    o_ref[...] = (acc + bias_ref[...]).astype(o_ref.dtype)


def ln_matmul_bias(x, gamma, beta, w, b):
    M, K = x.shape
    N = w.shape[1]
    return pl.pallas_call(
        _ln_matmul_bias_kernel,
        out_shape=jax.ShapeDtypeStruct((M, N), x.dtype),
        grid=(1,),
        in_specs=[
            pl.BlockSpec((M, K), lambda i: (0, 0)),
            pl.BlockSpec((1, K), lambda i: (0, 0)),
            pl.BlockSpec((1, K), lambda i: (0, 0)),
            pl.BlockSpec((K, N), lambda i: (0, 0)),
            pl.BlockSpec((1, N), lambda i: (0, 0)),
        ],
        out_specs=pl.BlockSpec((M, N), lambda i: (0, 0)),
    )(x, gamma, beta, w, b)


def _matmul_bias_residual_kernel(x_ref, w_ref, b_ref, res_ref, o_ref):
    acc = jnp.dot(x_ref[...].astype(jnp.bfloat16), w_ref[...],
                  preferred_element_type=jnp.float32)
    o_ref[...] = (res_ref[...] + acc + b_ref[...]).astype(o_ref.dtype)


def matmul_bias_residual(x, w, b, res):
    """res + x @ w + b, with the residual buffer aliased to the output."""
    M, K = x.shape
    N = w.shape[1]
    return pl.pallas_call(
        _matmul_bias_residual_kernel,
        out_shape=jax.ShapeDtypeStruct((M, N), res.dtype),
        grid=(1,),
        in_specs=[
            pl.BlockSpec((M, K), lambda i: (0, 0)),
            pl.BlockSpec((K, N), lambda i: (0, 0)),
            pl.BlockSpec((1, N), lambda i: (0, 0)),
            pl.BlockSpec((M, N), lambda i: (0, 0)),
        ],
        out_specs=pl.BlockSpec((M, N), lambda i: (0, 0)),
        input_output_aliases={3: 0},
    )(x, w, b, res)


def _ln_mlp_residual_kernel(x_ref, g_ref, b_ref, w1_ref, b1_ref,
                            w2_ref, b2_ref, o_ref):
    """Fused LN2 + fc1 + GELU + fc2 + residual add."""
    x = x_ref[...].astype(jnp.float32)
    mean = jnp.mean(x, axis=-1, keepdims=True)
    var = jnp.mean(jnp.square(x - mean), axis=-1, keepdims=True)
    h = (x - mean) * jax.lax.rsqrt(var + LN_EPS)
    h = h * g_ref[...] + b_ref[...]
    h1 = jnp.dot(h.astype(jnp.bfloat16), w1_ref[...],
                 preferred_element_type=jnp.float32) + b1_ref[...]
    h1 = _gelu_tanh(h1)
    h2 = jnp.dot(h1.astype(jnp.bfloat16), w2_ref[...],
                 preferred_element_type=jnp.float32) + b2_ref[...]
    o_ref[...] = (x + h2).astype(o_ref.dtype)


def ln_mlp_residual(x, gamma, beta, w1, b1, w2, b2):
    M, E = x.shape
    H = w1.shape[1]
    return pl.pallas_call(
        _ln_mlp_residual_kernel,
        out_shape=jax.ShapeDtypeStruct((M, E), x.dtype),
        grid=(1,),
        in_specs=[
            pl.BlockSpec((M, E), lambda i: (0, 0)),
            pl.BlockSpec((1, E), lambda i: (0, 0)),
            pl.BlockSpec((1, E), lambda i: (0, 0)),
            pl.BlockSpec((E, H), lambda i: (0, 0)),
            pl.BlockSpec((1, H), lambda i: (0, 0)),
            pl.BlockSpec((H, E), lambda i: (0, 0)),
            pl.BlockSpec((1, E), lambda i: (0, 0)),
        ],
        out_specs=pl.BlockSpec((M, E), lambda i: (0, 0)),
        input_output_aliases={0: 0},
    )(x, gamma, beta, w1, b1, w2, b2)


def _attention_kernel(q_ref, k_ref, v_ref, o_ref, *, scale):
    # All heads of one batch element per grid step.
    q = q_ref[0].astype(jnp.bfloat16)        # (H, S, Dh)
    k = k_ref[0].astype(jnp.bfloat16)
    v = v_ref[0].astype(jnp.bfloat16)
    s = jnp.einsum('hqd,hkd->hqk', q, k,
                   preferred_element_type=jnp.float32) * scale
    s = s - jnp.max(s, axis=-1, keepdims=True)
    p = jnp.exp(s)
    denom = jnp.sum(p, axis=-1, keepdims=True)
    p = p * pl.reciprocal(denom, approx=True)
    ctx = jnp.einsum('hqk,hkd->hqd', p.astype(jnp.bfloat16), v,
                     preferred_element_type=jnp.float32)
    o_ref[0] = ctx.astype(o_ref.dtype)


def attention(q, k, v):
    """q,k,v: (B, H, S, Dh) -> softmax(q k^T / sqrt(Dh)) v, per head."""
    B, H, S, Dh = q.shape
    return pl.pallas_call(
        functools.partial(_attention_kernel, scale=1.0 / math.sqrt(Dh)),
        out_shape=jax.ShapeDtypeStruct((B, H, S, Dh), q.dtype),
        grid=(B,),
        in_specs=[pl.BlockSpec((1, H, S, Dh), lambda b: (b, 0, 0, 0))] * 3,
        out_specs=pl.BlockSpec((1, H, S, Dh), lambda b: (b, 0, 0, 0)),
        compiler_params=pltpu.CompilerParams(
            dimension_semantics=("parallel",)),
    )(q, k, v)


# ----------------------------- parameters -----------------------------------
def init_params(key):
    ks = iter(jax.random.split(key, 64))
    p = {}
    pd = IN_CH * PATCH * PATCH
    p["patch_w"] = jax.random.normal(next(ks), (pd, EMBED), jnp.float32) * 0.02
    p["patch_b"] = jnp.zeros((1, EMBED), jnp.float32)
    p["cls"] = jax.random.normal(next(ks), (1, 1, EMBED), jnp.float32) * 0.02
    p["pos"] = jax.random.normal(next(ks), (1, SEQ, EMBED), jnp.float32) * 0.02
    p["blocks"] = []
    for _ in range(DEPTH):
        blk = {
            "ln1_g": jnp.ones((1, EMBED), jnp.float32),
            "ln1_b": jnp.zeros((1, EMBED), jnp.float32),
            "qkv_w": jax.random.normal(next(ks), (EMBED, 3 * EMBED), jnp.float32) * 0.02,
            "qkv_b": jnp.zeros((1, 3 * EMBED), jnp.float32),
            # PEFT inits lora_B to zeros; we use small nonzero values so the
            # LoRA path is numerically exercised.
            "lora_a": jax.random.normal(next(ks), (EMBED, LORA_R), jnp.float32) * 0.02,
            "lora_b": jax.random.normal(next(ks), (LORA_R, 3 * EMBED), jnp.float32) * 0.02,
            "proj_w": jax.random.normal(next(ks), (EMBED, EMBED), jnp.float32) * 0.02,
            "proj_b": jnp.zeros((1, EMBED), jnp.float32),
            "ln2_g": jnp.ones((1, EMBED), jnp.float32),
            "ln2_b": jnp.zeros((1, EMBED), jnp.float32),
            "fc1_w": jax.random.normal(next(ks), (EMBED, MLP_HIDDEN), jnp.float32) * 0.02,
            "fc1_b": jnp.zeros((1, MLP_HIDDEN), jnp.float32),
            "fc2_w": jax.random.normal(next(ks), (MLP_HIDDEN, EMBED), jnp.float32) * 0.02,
            "fc2_b": jnp.zeros((1, EMBED), jnp.float32),
        }
        p["blocks"].append(blk)
    p["ln_f_g"] = jnp.ones((1, EMBED), jnp.float32)
    p["ln_f_b"] = jnp.zeros((1, EMBED), jnp.float32)
    p["cls_w"] = jax.random.normal(next(ks), (EMBED, NUM_LABELS), jnp.float32) * 0.02
    p["cls_b"] = jnp.zeros((1, NUM_LABELS), jnp.float32)
    return p


def prepare_inference_params(p):
    """One-time inference prep: fold LoRA into qkv, pre-cast MXU weights to bf16.

    Folding W' = W + (alpha/r) * A @ B is exact (lora_dropout is identity in
    eval mode), so forward semantics are unchanged.  Biases / LN params stay f32.
    """
    ip = {
        "patch_w": p["patch_w"].astype(jnp.bfloat16),
        "patch_b": p["patch_b"],
        "cls": p["cls"],
        "pos": p["pos"],
        "ln_f_g": p["ln_f_g"],
        "ln_f_b": p["ln_f_b"],
        "cls_w": p["cls_w"],
        "cls_b": p["cls_b"],
        "blocks": [],
    }
    for blk in p["blocks"]:
        qkv_folded = blk["qkv_w"] + LORA_SCALE * (blk["lora_a"] @ blk["lora_b"])
        ip["blocks"].append({
            "ln1_g": blk["ln1_g"], "ln1_b": blk["ln1_b"],
            "qkv_w": qkv_folded.astype(jnp.bfloat16),
            "qkv_b": blk["qkv_b"],
            "proj_w": blk["proj_w"].astype(jnp.bfloat16),
            "proj_b": blk["proj_b"],
            "ln2_g": blk["ln2_g"], "ln2_b": blk["ln2_b"],
            "fc1_w": blk["fc1_w"].astype(jnp.bfloat16),
            "fc1_b": blk["fc1_b"],
            "fc2_w": blk["fc2_w"].astype(jnp.bfloat16),
            "fc2_b": blk["fc2_b"],
        })
    return ip


# ----------------------------- forward --------------------------------------
def patchify(x):
    """NCHW -> (B, num_patches, C*P*P); equivalent to unfold of the conv."""
    B, C, H, W = x.shape
    ph, pw = H // PATCH, W // PATCH
    x = x.reshape(B, C, ph, PATCH, pw, PATCH)
    x = x.transpose(0, 2, 4, 1, 3, 5)          # B, ph, pw, C, p, p
    return x.reshape(B, ph * pw, C * PATCH * PATCH)


def transformer_block(x, blk):
    B, S, E = x.shape
    x2d = x.reshape(B * S, E)

    # LN1 + (LoRA-folded) qkv projection, fused.
    qkv = ln_matmul_bias(x2d, blk["ln1_g"], blk["ln1_b"],
                         blk["qkv_w"], blk["qkv_b"])           # (B*S, 3E)
    qkv = qkv.reshape(B, S, 3, HEADS, HEAD_DIM).transpose(2, 0, 3, 1, 4)
    ctx = attention(qkv[0], qkv[1], qkv[2])                    # (B, H, S, Dh)
    ctx = ctx.transpose(0, 2, 1, 3).reshape(B * S, E)

    # attention output projection + residual add (aliased output).
    x2d = matmul_bias_residual(ctx, blk["proj_w"], blk["proj_b"], x2d)

    # LN2 + MLP + residual, fused (aliased output).
    x2d = ln_mlp_residual(x2d, blk["ln2_g"], blk["ln2_b"],
                          blk["fc1_w"], blk["fc1_b"],
                          blk["fc2_w"], blk["fc2_b"])
    return x2d.reshape(B, S, E)


def lora_model_forward(ip, x):
    """x: NCHW float32 image batch -> (B, NUM_LABELS) logits."""
    B = x.shape[0]
    patches = patchify(x).reshape(B * NUM_PATCHES, -1)          # (B*Np, C*P*P)
    tok = matmul_bias(patches, ip["patch_w"], ip["patch_b"])    # patch embed
    tok = tok.reshape(B, NUM_PATCHES, EMBED)
    cls = jnp.broadcast_to(ip["cls"], (B, 1, EMBED))
    tok = jnp.concatenate([cls, tok], axis=1) + ip["pos"]       # (B, S, E)

    for blk in ip["blocks"]:
        tok = transformer_block(tok, blk)

    # Final LN + classifier on the CLS token only (identical to norming all
    # tokens then slicing CLS).  2x32 / 2x14 shapes are far below pallas_call
    # overhead and would be masked partial stores, so leave them to XLA.
    cls_tok = tok[:, 0, :].astype(jnp.float32)                  # (B, E)
    mean = jnp.mean(cls_tok, axis=-1, keepdims=True)
    var = jnp.mean(jnp.square(cls_tok - mean), axis=-1, keepdims=True)
    feat = (cls_tok - mean) * jax.lax.rsqrt(var + LN_EPS)
    feat = feat * ip["ln_f_g"] + ip["ln_f_b"]
    logits = feat @ ip["cls_w"] + ip["cls_b"]                   # (B, NUM_LABELS)
    return logits


# ----------------------------- main ------------------------------------------
if __name__ == "__main__":
    key = jax.random.PRNGKey(0)
    pkey, xkey = jax.random.split(key)
    params = init_params(pkey)
    infer_params = prepare_inference_params(params)
    x = jax.random.normal(xkey, (2, IN_CH, IMG, IMG), jnp.float32)  # NCHW

    forward = jax.jit(lora_model_forward)
    logits = forward(infer_params, x)
    jax.block_until_ready(logits)
    assert logits.shape == (2, NUM_LABELS) and logits.dtype == jnp.float32
    print("KERNEL_OK")
</pallas_src>

<mosaic_0001>
module attributes {stable_mosaic.version = 11 : i64} {
  func.func @_matmul_bias_kernel(%arg0: i32, %arg1: memref<32x48xf32, #tpu.memory_space<vmem>>, %arg2: memref<48x32xbf16, #tpu.memory_space<vmem>>, %arg3: memref<1x32xf32, #tpu.memory_space<vmem>>, %arg4: memref<32x32xf32, #tpu.memory_space<vmem>>) attributes {dimension_semantics = [#tpu.dimension_semantics<arbitrary>], iteration_bounds = array<i64: 1>, scalar_prefetch = 0 : i64, scratch_operands = 0 : i64, tpu.core_type = #tpu.core_type<tc>, window_params = [{pipeline_mode = #tpu.pipeline_mode<synchronous>, transform_indices = @transform_0, window_bounds = array<i64: 32, 48>}, {pipeline_mode = #tpu.pipeline_mode<synchronous>, transform_indices = @transform_1, window_bounds = array<i64: 48, 32>}, {pipeline_mode = #tpu.pipeline_mode<synchronous>, transform_indices = @transform_2, window_bounds = array<i64: 1, 32>}, {pipeline_mode = #tpu.pipeline_mode<synchronous>, transform_indices = @transform_3, window_bounds = array<i64: 32, 32>}]} {
    %c0 = arith.constant 0 : index
    %c0_0 = arith.constant 0 : index
    %0 = vector.load %arg1[%c0, %c0_0] : memref<32x48xf32, #tpu.memory_space<vmem>>, vector<32x48xf32>
    %1 = arith.truncf %0 : vector<32x48xf32> to vector<32x48xbf16>
    %c0_1 = arith.constant 0 : index
    %c0_2 = arith.constant 0 : index
    %2 = vector.load %arg2[%c0_1, %c0_2] : memref<48x32xbf16, #tpu.memory_space<vmem>>, vector<48x32xbf16>
    %cst = arith.constant dense<0.000000e+00> : vector<32x32xf32>
    %3 = tpu.matmul %1, %2, %cst {dimension_numbers = #tpu.dot_dimension_numbers<[1], [0], [0], [1], [0, 0, 1, 1], [], []>} : vector<32x48xbf16>, vector<48x32xbf16>, vector<32x32xf32> -> vector<32x32xf32>
    %c0_3 = arith.constant 0 : index
    %c0_4 = arith.constant 0 : index
    %4 = vector.load %arg3[%c0_3, %c0_4] : memref<1x32xf32, #tpu.memory_space<vmem>>, vector<1x32xf32>
    %5 = vector.broadcast %4 : vector<1x32xf32> to vector<32x32xf32>
    %6 = arith.addf %3, %5 : vector<32x32xf32>
    %c0_5 = arith.constant 0 : index
    %c0_6 = arith.constant 0 : index
    %7 = vector.load %arg4[%c0_5, %c0_6] : memref<32x32xf32, #tpu.memory_space<vmem>>, vector<32x32xf32>
    tpu.vector_store %arg4[%c0_5, %c0_6], %6 {strides = array<i32>} : memref<32x32xf32, #tpu.memory_space<vmem>>, vector<32x32xf32>,
    return
  }
  func.func @transform_0(%arg0: i32) -> (i32, i32) {
    %c0_i32 = arith.constant 0 : i32
    %c0_i32_0 = arith.constant 0 : i32
    %c0_i32_1 = arith.constant 0 : i32
    return %c0_i32, %c0_i32_0 : i32, i32
  }
  func.func @transform_1(%arg0: i32) -> (i32, i32) {
    %c0_i32 = arith.constant 0 : i32
    %c0_i32_0 = arith.constant 0 : i32
    %c0_i32_1 = arith.constant 0 : i32
    return %c0_i32, %c0_i32_0 : i32, i32
  }
  func.func @transform_2(%arg0: i32) -> (i32, i32) {
    %c0_i32 = arith.constant 0 : i32
    %c0_i32_0 = arith.constant 0 : i32
    %c0_i32_1 = arith.constant 0 : i32
    return %c0_i32, %c0_i32_0 : i32, i32
  }
  func.func @transform_3(%arg0: i32) -> (i32, i32) {
    %c0_i32 = arith.constant 0 : i32
    %c0_i32_0 = arith.constant 0 : i32
    %c0_i32_1 = arith.constant 0 : i32
    return %c0_i32, %c0_i32_0 : i32, i32
  }
}

module attributes {stable_mosaic.version = 11 : i64} {
  func.func @_ln_matmul_bias_kernel(%arg0: i32, %arg1: memref<34x32xf32, #tpu.memory_space<vmem>>, %arg2: memref<1x32xf32, #tpu.memory_space<vmem>>, %arg3: memref<1x32xf32, #tpu.memory_space<vmem>>, %arg4: memref<32x96xbf16, #tpu.memory_space<vmem>>, %arg5: memref<1x96xf32, #tpu.memory_space<vmem>>, %arg6: memref<34x96xf32, #tpu.memory_space<vmem>>) attributes {dimension_semantics = [#tpu.dimension_semantics<arbitrary>], iteration_bounds = array<i64: 1>, scalar_prefetch = 0 : i64, scratch_operands = 0 : i64, tpu.core_type = #tpu.core_type<tc>, window_params = [{pipeline_mode = #tpu.pipeline_mode<synchronous>, transform_indices = @transform_0, window_bounds = array<i64: 34, 32>}, {pipeline_mode = #tpu.pipeline_mode<synchronous>, transform_indices = @transform_1, window_bounds = array<i64: 1, 32>}, {pipeline_mode = #tpu.pipeline_mode<synchronous>, transform_indices = @transform_2, window_bounds = array<i64: 1, 32>}, {pipeline_mode = #tpu.pipeline_mode<synchronous>, transform_indices = @transform_3, window_bounds = array<i64: 32, 96>}, {pipeline_mode = #tpu.pipeline_mode<synchronous>, transform_indices = @transform_4, window_bounds = array<i64: 1, 96>}, {pipeline_mode = #tpu.pipeline_mode<synchronous>, transform_indices = @transform_5, window_bounds = array<i64: 34, 96>}]} {
    %c0 = arith.constant 0 : index
    %c0_0 = arith.constant 0 : index
    %0 = vector.load %arg1[%c0, %c0_0] : memref<34x32xf32, #tpu.memory_space<vmem>>, vector<34x32xf32>
    %cst = arith.constant dense<0.000000e+00> : vector<34xf32>
    %1 = vector.multi_reduction <add>, %0, %cst [1] : vector<34x32xf32> to vector<34xf32>
    %2 = vector.shape_cast %1 : vector<34xf32> to vector<34x1xf32>
    %cst_1 = arith.constant 3.200000e+01 : f32
    %3 = vector.broadcast %cst_1 : f32 to vector<34x1xf32>
    %4 = arith.divf %2, %3 : vector<34x1xf32>
    %5 = vector.broadcast %4 : vector<34x1xf32> to vector<34x32xf32>
    %6 = arith.subf %0, %5 : vector<34x32xf32>
    %7 = arith.mulf %6, %6 : vector<34x32xf32>
    %cst_2 = arith.constant dense<0.000000e+00> : vector<34xf32>
    %8 = vector.multi_reduction <add>, %7, %cst_2 [1] : vector<34x32xf32> to vector<34xf32>
    %9 = vector.shape_cast %8 : vector<34xf32> to vector<34x1xf32>
    %cst_3 = arith.constant 3.200000e+01 : f32
    %10 = vector.broadcast %cst_3 : f32 to vector<34x1xf32>
    %11 = arith.divf %9, %10 : vector<34x1xf32>
    %12 = vector.broadcast %4 : vector<34x1xf32> to vector<34x32xf32>
    %13 = arith.subf %0, %12 : vector<34x32xf32>
    %cst_4 = arith.constant 9.99999997E-7 : f32
    %14 = vector.broadcast %cst_4 : f32 to vector<34x1xf32>
    %15 = arith.addf %11, %14 : vector<34x1xf32>
    %16 = math.rsqrt %15 : vector<34x1xf32>
    %17 = vector.broadcast %16 : vector<34x1xf32> to vector<34x32xf32>
    %18 = arith.mulf %13, %17 : vector<34x32xf32>
    %c0_5 = arith.constant 0 : index
    %c0_6 = arith.constant 0 : index
    %19 = vector.load %arg2[%c0_5, %c0_6] : memref<1x32xf32, #tpu.memory_space<vmem>>, vector<1x32xf32>
    %20 = vector.broadcast %19 : vector<1x32xf32> to vector<34x32xf32>
    %21 = arith.mulf %18, %20 : vector<34x32xf32>
    %c0_7 = arith.constant 0 : index
    %c0_8 = arith.constant 0 : index
    %22 = vector.load %arg3[%c0_7, %c0_8] : memref<1x32xf32, #tpu.memory_space<vmem>>, vector<1x32xf32>
    %23 = vector.broadcast %22 : vector<1x32xf32> to vector<34x32xf32>
    %24 = arith.addf %21, %23 : vector<34x32xf32>
    %25 = arith.truncf %24 : vector<34x32xf32> to vector<34x32xbf16>
    %c0_9 = arith.constant 0 : index
    %c0_10 = arith.constant 0 : index
    %26 = vector.load %arg4[%c0_9, %c0_10] : memref<32x96xbf16, #tpu.memory_space<vmem>>, vector<32x96xbf16>
    %cst_11 = arith.constant dense<0.000000e+00> : vector<34x96xf32>
    %27 = tpu.matmul %25, %26, %cst_11 {dimension_numbers = #tpu.dot_dimension_numbers<[1], [0], [0], [1], [0, 0, 1, 1], [], []>} : vector<34x32xbf16>, vector<32x96xbf16>, vector<34x96xf32> -> vector<34x96xf32>
    %c0_12 = arith.constant 0 : index
    %c0_13 = arith.constant 0 : index
    %28 = vector.load %arg5[%c0_12, %c0_13] : memref<1x96xf32, #tpu.memory_space<vmem>>, vector<1x96xf32>
    %29 = vector.broadcast %28 : vector<1x96xf32> to vector<34x96xf32>
    %30 = arith.addf %27, %29 : vector<34x96xf32>
    %c0_14 = arith.constant 0 : index
    %c0_15 = arith.constant 0 : index
    %31 = vector.load %arg6[%c0_14, %c0_15] : memref<34x96xf32, #tpu.memory_space<vmem>>, vector<34x96xf32>
    tpu.vector_store %arg6[%c0_14, %c0_15], %30 {strides = array<i32>} : memref<34x96xf32, #tpu.memory_space<vmem>>, vector<34x96xf32>,
    return
  }
  func.func @transform_0(%arg0: i32) -> (i32, i32) {
    %c0_i32 = arith.constant 0 : i32
    %c0_i32_0 = arith.constant 0 : i32
    %c0_i32_1 = arith.constant 0 : i32
    return %c0_i32, %c0_i32_0 : i32, i32
  }
  func.func @transform_1(%arg0: i32) -> (i32, i32) {
    %c0_i32 = arith.constant 0 : i32
    %c0_i32_0 = arith.constant 0 : i32
    %c0_i32_1 = arith.constant 0 : i32
    return %c0_i32, %c0_i32_0 : i32, i32
  }
  func.func @transform_2(%arg0: i32) -> (i32, i32) {
    %c0_i32 = arith.constant 0 : i32
    %c0_i32_0 = arith.constant 0 : i32
    %c0_i32_1 = arith.constant 0 : i32
    return %c0_i32, %c0_i32_0 : i32, i32
  }
  func.func @transform_3(%arg0: i32) -> (i32, i32) {
    %c0_i32 = arith.constant 0 : i32
    %c0_i32_0 = arith.constant 0 : i32
    %c0_i32_1 = arith.constant 0 : i32
    return %c0_i32, %c0_i32_0 : i32, i32
  }
  func.func @transform_4(%arg0: i32) -> (i32, i32) {
    %c0_i32 = arith.constant 0 : i32
    %c0_i32_0 = arith.constant 0 : i32
    %c0_i32_1 = arith.constant 0 : i32
    return %c0_i32, %c0_i32_0 : i32, i32
  }
  func.func @transform_5(%arg0: i32) -> (i32, i32) {
    %c0_i32 = arith.constant 0 : i32
    %c0_i32_0 = arith.constant 0 : i32
    %c0_i32_1 = arith.constant 0 : i32
    return %c0_i32, %c0_i32_0 : i32, i32
  }
}

module attributes {stable_mosaic.version = 11 : i64} {
  func.func @_attention_kernel(%arg0: i32, %arg1: memref<1x4x17x8xf32, #tpu.memory_space<vmem>>, %arg2: memref<1x4x17x8xf32, #tpu.memory_space<vmem>>, %arg3: memref<1x4x17x8xf32, #tpu.memory_space<vmem>>, %arg4: memref<1x4x17x8xf32, #tpu.memory_space<vmem>>) attributes {dimension_semantics = [#tpu.dimension_semantics<parallel>], iteration_bounds = array<i64: 2>, scalar_prefetch = 0 : i64, scratch_operands = 0 : i64, tpu.core_type = #tpu.core_type<tc>, window_params = [{transform_indices = @transform_0, window_bounds = array<i64: 1, 4, 17, 8>}, {transform_indices = @transform_1, window_bounds = array<i64: 1, 4, 17, 8>}, {transform_indices = @transform_2, window_bounds = array<i64: 1, 4, 17, 8>}, {transform_indices = @transform_3, window_bounds = array<i64: 1, 4, 17, 8>}]} {
    %c0 = arith.constant 0 : index
    %c0_0 = arith.constant 0 : index
    %c0_1 = arith.constant 0 : index
    %c0_2 = arith.constant 0 : index
    %0 = vector.load %arg1[%c0, %c0_0, %c0_1, %c0_2] : memref<1x4x17x8xf32, #tpu.memory_space<vmem>>, vector<1x4x17x8xf32>
    %1 = vector.shape_cast %0 : vector<1x4x17x8xf32> to vector<4x17x8xf32>
    %2 = arith.truncf %1 : vector<4x17x8xf32> to vector<4x17x8xbf16>
    %c0_3 = arith.constant 0 : index
    %c0_4 = arith.constant 0 : index
    %c0_5 = arith.constant 0 : index
    %c0_6 = arith.constant 0 : index
    %3 = vector.load %arg2[%c0_3, %c0_4, %c0_5, %c0_6] : memref<1x4x17x8xf32, #tpu.memory_space<vmem>>, vector<1x4x17x8xf32>
    %4 = vector.shape_cast %3 : vector<1x4x17x8xf32> to vector<4x17x8xf32>
    %5 = arith.truncf %4 : vector<4x17x8xf32> to vector<4x17x8xbf16>
    %c0_7 = arith.constant 0 : index
    %c0_8 = arith.constant 0 : index
    %c0_9 = arith.constant 0 : index
    %c0_10 = arith.constant 0 : index
    %6 = vector.load %arg3[%c0_7, %c0_8, %c0_9, %c0_10] : memref<1x4x17x8xf32, #tpu.memory_space<vmem>>, vector<1x4x17x8xf32>
    %7 = vector.shape_cast %6 : vector<1x4x17x8xf32> to vector<4x17x8xf32>
    %8 = arith.truncf %7 : vector<4x17x8xf32> to vector<4x17x8xbf16>
    "tpu.trace_start"() <{level = 10 : i32, message = "hqd,hkd->hqk"}> : () -> ()
    %cst = arith.constant dense<0.000000e+00> : vector<4x17x17xf32>
    %9 = tpu.matmul %2, %5, %cst {dimension_numbers = #tpu.dot_dimension_numbers<[2], [2], [1], [1], [0, 0, 0, 1, 1, 1], [0], [0]>} : vector<4x17x8xbf16>, vector<4x17x8xbf16>, vector<4x17x17xf32> -> vector<4x17x17xf32>
    "tpu.trace_stop"() : () -> ()
    %cst_11 = arith.constant 0.353553385 : f32
    %10 = vector.broadcast %cst_11 : f32 to vector<4x17x17xf32>
    %11 = arith.mulf %9, %10 : vector<4x17x17xf32>
    %cst_12 = arith.constant dense<0xFF800000> : vector<4x17xf32>
    %12 = vector.multi_reduction <maximumf>, %11, %cst_12 [2] : vector<4x17x17xf32> to vector<4x17xf32>
    %13 = vector.shape_cast %12 : vector<4x17xf32> to vector<4x17x1xf32>
    %14 = vector.broadcast %13 : vector<4x17x1xf32> to vector<4x17x17xf32>
    %15 = arith.subf %11, %14 : vector<4x17x17xf32>
    %16 = math.exp %15 : vector<4x17x17xf32>
    %cst_13 = arith.constant dense<0.000000e+00> : vector<4x17xf32>
    %17 = vector.multi_reduction <add>, %16, %cst_13 [2] : vector<4x17x17xf32> to vector<4x17xf32>
    %18 = vector.shape_cast %17 : vector<4x17xf32> to vector<4x17x1xf32>
    %19 = tpu.reciprocal %18 {approx = true} : vector<4x17x1xf32> -> vector<4x17x1xf32>
    %20 = vector.broadcast %19 : vector<4x17x1xf32> to vector<4x17x17xf32>
    %21 = arith.mulf %16, %20 : vector<4x17x17xf32>
    %22 = arith.truncf %21 : vector<4x17x17xf32> to vector<4x17x17xbf16>
    "tpu.trace_start"() <{level = 10 : i32, message = "hqk,hkd->hqd"}> : () -> ()
    %cst_14 = arith.constant dense<0.000000e+00> : vector<4x17x8xf32>
    %23 = tpu.matmul %22, %8, %cst_14 {dimension_numbers = #tpu.dot_dimension_numbers<[2], [1], [1], [2], [0, 0, 0, 1, 1, 2], [0], [0]>} : vector<4x17x17xbf16>, vector<4x17x8xbf16>, vector<4x17x8xf32> -> vector<4x17x8xf32>
    "tpu.trace_stop"() : () -> ()
    %c0_15 = arith.constant 0 : index
    %c0_16 = arith.constant 0 : index
    %c0_17 = arith.constant 0 : index
    %c0_18 = arith.constant 0 : index
    %24 = vector.load %arg4[%c0_15, %c0_16, %c0_17, %c0_18] : memref<1x4x17x8xf32, #tpu.memory_space<vmem>>, vector<1x4x17x8xf32>
    %25 = vector.shape_cast %24 : vector<1x4x17x8xf32> to vector<4x17x8xf32>
    %26 = vector.shape_cast %23 : vector<4x17x8xf32> to vector<1x4x17x8xf32>
    tpu.vector_store %arg4[%c0_15, %c0_16, %c0_17, %c0_18], %26 {strides = array<i32>} : memref<1x4x17x8xf32, #tpu.memory_space<vmem>>, vector<1x4x17x8xf32>,
    return
  }
  func.func @transform_0(%arg0: i32) -> (i32, i32, i32, i32) {
    %c0_i32 = arith.constant 0 : i32
    %c0_i32_0 = arith.constant 0 : i32
    %c0_i32_1 = arith.constant 0 : i32
    %c0_i32_2 = arith.constant 0 : i32
    return %arg0, %c0_i32, %c0_i32_0, %c0_i32_1 : i32, i32, i32, i32
  }
  func.func @transform_1(%arg0: i32) -> (i32, i32, i32, i32) {
    %c0_i32 = arith.constant 0 : i32
    %c0_i32_0 = arith.constant 0 : i32
    %c0_i32_1 = arith.constant 0 : i32
    %c0_i32_2 = arith.constant 0 : i32
    return %arg0, %c0_i32, %c0_i32_0, %c0_i32_1 : i32, i32, i32, i32
  }
  func.func @transform_2(%arg0: i32) -> (i32, i32, i32, i32) {
    %c0_i32 = arith.constant 0 : i32
    %c0_i32_0 = arith.constant 0 : i32
    %c0_i32_1 = arith.constant 0 : i32
    %c0_i32_2 = arith.constant 0 : i32
    return %arg0, %c0_i32, %c0_i32_0, %c0_i32_1 : i32, i32, i32, i32
  }
  func.func @transform_3(%arg0: i32) -> (i32, i32, i32, i32) {
    %c0_i32 = arith.constant 0 : i32
    %c0_i32_0 = arith.constant 0 : i32
    %c0_i32_1 = arith.constant 0 : i32
    %c0_i32_2 = arith.constant 0 : i32
    return %arg0, %c0_i32, %c0_i32_0, %c0_i32_1 : i32, i32, i32, i32
  }
}

module attributes {stable_mosaic.version = 11 : i64} {
  func.func @_matmul_bias_residual_kernel(%arg0: i32, %arg1: memref<34x32xf32, #tpu.memory_space<vmem>>, %arg2: memref<32x32xbf16, #tpu.memory_space<vmem>>, %arg3: memref<1x32xf32, #tpu.memory_space<vmem>>, %arg4: memref<34x32xf32, #tpu.memory_space<vmem>>, %arg5: memref<34x32xf32, #tpu.memory_space<vmem>>) attributes {dimension_semantics = [#tpu.dimension_semantics<arbitrary>], iteration_bounds = array<i64: 1>, scalar_prefetch = 0 : i64, scratch_operands = 0 : i64, tpu.core_type = #tpu.core_type<tc>, window_params = [{pipeline_mode = #tpu.pipeline_mode<synchronous>, transform_indices = @transform_0, window_bounds = array<i64: 34, 32>}, {pipeline_mode = #tpu.pipeline_mode<synchronous>, transform_indices = @transform_1, window_bounds = array<i64: 32, 32>}, {pipeline_mode = #tpu.pipeline_mode<synchronous>, transform_indices = @transform_2, window_bounds = array<i64: 1, 32>}, {pipeline_mode = #tpu.pipeline_mode<synchronous>, transform_indices = @transform_3, window_bounds = array<i64: 34, 32>}, {pipeline_mode = #tpu.pipeline_mode<synchronous>, transform_indices = @transform_4, window_bounds = array<i64: 34, 32>}]} {
    %c0 = arith.constant 0 : index
    %c0_0 = arith.constant 0 : index
    %0 = vector.load %arg1[%c0, %c0_0] : memref<34x32xf32, #tpu.memory_space<vmem>>, vector<34x32xf32>
    %1 = arith.truncf %0 : vector<34x32xf32> to vector<34x32xbf16>
    %c0_1 = arith.constant 0 : index
    %c0_2 = arith.constant 0 : index
    %2 = vector.load %arg2[%c0_1, %c0_2] : memref<32x32xbf16, #tpu.memory_space<vmem>>, vector<32x32xbf16>
    %cst = arith.constant dense<0.000000e+00> : vector<34x32xf32>
    %3 = tpu.matmul %1, %2, %cst {dimension_numbers = #tpu.dot_dimension_numbers<[1], [0], [0], [1], [0, 0, 1, 1], [], []>} : vector<34x32xbf16>, vector<32x32xbf16>, vector<34x32xf32> -> vector<34x32xf32>
    %c0_3 = arith.constant 0 : index
    %c0_4 = arith.constant 0 : index
    %4 = vector.load %arg4[%c0_3, %c0_4] : memref<34x32xf32, #tpu.memory_space<vmem>>, vector<34x32xf32>
    %5 = arith.addf %4, %3 : vector<34x32xf32>
    %c0_5 = arith.constant 0 : index
    %c0_6 = arith.constant 0 : index
    %6 = vector.load %arg3[%c0_5, %c0_6] : memref<1x32xf32, #tpu.memory_space<vmem>>, vector<1x32xf32>
    %7 = vector.broadcast %6 : vector<1x32xf32> to vector<34x32xf32>
    %8 = arith.addf %5, %7 : vector<34x32xf32>
    %c0_7 = arith.constant 0 : index
    %c0_8 = arith.constant 0 : index
    %9 = vector.load %arg5[%c0_7, %c0_8] : memref<34x32xf32, #tpu.memory_space<vmem>>, vector<34x32xf32>
    tpu.vector_store %arg5[%c0_7, %c0_8], %8 {strides = array<i32>} : memref<34x32xf32, #tpu.memory_space<vmem>>, vector<34x32xf32>,
    return
  }
  func.func @transform_0(%arg0: i32) -> (i32, i32) {
    %c0_i32 = arith.constant 0 : i32
    %c0_i32_0 = arith.constant 0 : i32
    %c0_i32_1 = arith.constant 0 : i32
    return %c0_i32, %c0_i32_0 : i32, i32
  }
  func.func @transform_1(%arg0: i32) -> (i32, i32) {
    %c0_i32 = arith.constant 0 : i32
    %c0_i32_0 = arith.constant 0 : i32
    %c0_i32_1 = arith.constant 0 : i32
    return %c0_i32, %c0_i32_0 : i32, i32
  }
  func.func @transform_2(%arg0: i32) -> (i32, i32) {
    %c0_i32 = arith.constant 0 : i32
    %c0_i32_0 = arith.constant 0 : i32
    %c0_i32_1 = arith.constant 0 : i32
    return %c0_i32, %c0_i32_0 : i32, i32
  }
  func.func @transform_3(%arg0: i32) -> (i32, i32) {
    %c0_i32 = arith.constant 0 : i32
    %c0_i32_0 = arith.constant 0 : i32
    %c0_i32_1 = arith.constant 0 : i32
    return %c0_i32, %c0_i32_0 : i32, i32
  }
  func.func @transform_4(%arg0: i32) -> (i32, i32) {
    %c0_i32 = arith.constant 0 : i32
    %c0_i32_0 = arith.constant 0 : i32
    %c0_i32_1 = arith.constant 0 : i32
    return %c0_i32, %c0_i32_0 : i32, i32
  }
}

module attributes {stable_mosaic.version = 11 : i64} {
  func.func @_ln_mlp_residual_kernel(%arg0: i32, %arg1: memref<34x32xf32, #tpu.memory_space<vmem>>, %arg2: memref<1x32xf32, #tpu.memory_space<vmem>>, %arg3: memref<1x32xf32, #tpu.memory_space<vmem>>, %arg4: memref<32x128xbf16, #tpu.memory_space<vmem>>, %arg5: memref<1x128xf32, #tpu.memory_space<vmem>>, %arg6: memref<128x32xbf16, #tpu.memory_space<vmem>>, %arg7: memref<1x32xf32, #tpu.memory_space<vmem>>, %arg8: memref<34x32xf32, #tpu.memory_space<vmem>>) attributes {dimension_semantics = [#tpu.dimension_semantics<arbitrary>], iteration_bounds = array<i64: 1>, scalar_prefetch = 0 : i64, scratch_operands = 0 : i64, tpu.core_type = #tpu.core_type<tc>, window_params = [{pipeline_mode = #tpu.pipeline_mode<synchronous>, transform_indices = @transform_0, window_bounds = array<i64: 34, 32>}, {pipeline_mode = #tpu.pipeline_mode<synchronous>, transform_indices = @transform_1, window_bounds = array<i64: 1, 32>}, {pipeline_mode = #tpu.pipeline_mode<synchronous>, transform_indices = @transform_2, window_bounds = array<i64: 1, 32>}, {pipeline_mode = #tpu.pipeline_mode<synchronous>, transform_indices = @transform_3, window_bounds = array<i64: 32, 128>}, {pipeline_mode = #tpu.pipeline_mode<synchronous>, transform_indices = @transform_4, window_bounds = array<i64: 1, 128>}, {pipeline_mode = #tpu.pipeline_mode<synchronous>, transform_indices = @transform_5, window_bounds = array<i64: 128, 32>}, {pipeline_mode = #tpu.pipeline_mode<synchronous>, transform_indices = @transform_6, window_bounds = array<i64: 1, 32>}, {pipeline_mode = #tpu.pipeline_mode<synchronous>, transform_indices = @transform_7, window_bounds = array<i64: 34, 32>}]} {
    %c0 = arith.constant 0 : index
    %c0_0 = arith.constant 0 : index
    %0 = vector.load %arg1[%c0, %c0_0] : memref<34x32xf32, #tpu.memory_space<vmem>>, vector<34x32xf32>
    %cst = arith.constant dense<0.000000e+00> : vector<34xf32>
    %1 = vector.multi_reduction <add>, %0, %cst [1] : vector<34x32xf32> to vector<34xf32>
    %2 = vector.shape_cast %1 : vector<34xf32> to vector<34x1xf32>
    %cst_1 = arith.constant 3.200000e+01 : f32
    %3 = vector.broadcast %cst_1 : f32 to vector<34x1xf32>
    %4 = arith.divf %2, %3 : vector<34x1xf32>
    %5 = vector.broadcast %4 : vector<34x1xf32> to vector<34x32xf32>
    %6 = arith.subf %0, %5 : vector<34x32xf32>
    %7 = arith.mulf %6, %6 : vector<34x32xf32>
    %cst_2 = arith.constant dense<0.000000e+00> : vector<34xf32>
    %8 = vector.multi_reduction <add>, %7, %cst_2 [1] : vector<34x32xf32> to vector<34xf32>
    %9 = vector.shape_cast %8 : vector<34xf32> to vector<34x1xf32>
    %cst_3 = arith.constant 3.200000e+01 : f32
    %10 = vector.broadcast %cst_3 : f32 to vector<34x1xf32>
    %11 = arith.divf %9, %10 : vector<34x1xf32>
    %12 = vector.broadcast %4 : vector<34x1xf32> to vector<34x32xf32>
    %13 = arith.subf %0, %12 : vector<34x32xf32>
    %cst_4 = arith.constant 9.99999997E-7 : f32
    %14 = vector.broadcast %cst_4 : f32 to vector<34x1xf32>
    %15 = arith.addf %11, %14 : vector<34x1xf32>
    %16 = math.rsqrt %15 : vector<34x1xf32>
    %17 = vector.broadcast %16 : vector<34x1xf32> to vector<34x32xf32>
    %18 = arith.mulf %13, %17 : vector<34x32xf32>
    %c0_5 = arith.constant 0 : index
    %c0_6 = arith.constant 0 : index
    %19 = vector.load %arg2[%c0_5, %c0_6] : memref<1x32xf32, #tpu.memory_space<vmem>>, vector<1x32xf32>
    %20 = vector.broadcast %19 : vector<1x32xf32> to vector<34x32xf32>
    %21 = arith.mulf %18, %20 : vector<34x32xf32>
    %c0_7 = arith.constant 0 : index
    %c0_8 = arith.constant 0 : index
    %22 = vector.load %arg3[%c0_7, %c0_8] : memref<1x32xf32, #tpu.memory_space<vmem>>, vector<1x32xf32>
    %23 = vector.broadcast %22 : vector<1x32xf32> to vector<34x32xf32>
    %24 = arith.addf %21, %23 : vector<34x32xf32>
    %25 = arith.truncf %24 : vector<34x32xf32> to vector<34x32xbf16>
    %c0_9 = arith.constant 0 : index
    %c0_10 = arith.constant 0 : index
    %26 = vector.load %arg4[%c0_9, %c0_10] : memref<32x128xbf16, #tpu.memory_space<vmem>>, vector<32x128xbf16>
    %cst_11 = arith.constant dense<0.000000e+00> : vector<34x128xf32>
    %27 = tpu.matmul %25, %26, %cst_11 {dimension_numbers = #tpu.dot_dimension_numbers<[1], [0], [0], [1], [0, 0, 1, 1], [], []>} : vector<34x32xbf16>, vector<32x128xbf16>, vector<34x128xf32> -> vector<34x128xf32>
    %c0_12 = arith.constant 0 : index
    %c0_13 = arith.constant 0 : index
    %28 = vector.load %arg5[%c0_12, %c0_13] : memref<1x128xf32, #tpu.memory_space<vmem>>, vector<1x128xf32>
    %29 = vector.broadcast %28 : vector<1x128xf32> to vector<34x128xf32>
    %30 = arith.addf %27, %29 : vector<34x128xf32>
    %cst_14 = arith.constant 5.000000e-01 : f32
    %31 = vector.broadcast %cst_14 : f32 to vector<34x128xf32>
    %32 = arith.mulf %31, %30 : vector<34x128xf32>
    %cst_15 = arith.constant 4.471500e-02 : f32
    %33 = vector.broadcast %cst_15 : f32 to vector<34x128xf32>
    %34 = arith.mulf %33, %30 : vector<34x128xf32>
    %35 = arith.mulf %34, %30 : vector<34x128xf32>
    %36 = arith.mulf %35, %30 : vector<34x128xf32>
    %37 = arith.addf %30, %36 : vector<34x128xf32>
    %cst_16 = arith.constant 0.797884583 : f32
    %38 = vector.broadcast %cst_16 : f32 to vector<34x128xf32>
    %39 = arith.mulf %38, %37 : vector<34x128xf32>
    %40 = math.tanh %39 : vector<34x128xf32>
    %cst_17 = arith.constant 1.000000e+00 : f32
    %41 = vector.broadcast %cst_17 : f32 to vector<34x128xf32>
    %42 = arith.addf %41, %40 : vector<34x128xf32>
    %43 = arith.mulf %32, %42 : vector<34x128xf32>
    %44 = arith.truncf %43 : vector<34x128xf32> to vector<34x128xbf16>
    %c0_18 = arith.constant 0 : index
    %c0_19 = arith.constant 0 : index
    %45 = vector.load %arg6[%c0_18, %c0_19] : memref<128x32xbf16, #tpu.memory_space<vmem>>, vector<128x32xbf16>
    %cst_20 = arith.constant dense<0.000000e+00> : vector<34x32xf32>
    %46 = tpu.matmul %44, %45, %cst_20 {dimension_numbers = #tpu.dot_dimension_numbers<[1], [0], [0], [1], [0, 0, 1, 1], [], []>} : vector<34x128xbf16>, vector<128x32xbf16>, vector<34x32xf32> -> vector<34x32xf32>
    %c0_21 = arith.constant 0 : index
    %c0_22 = arith.constant 0 : index
    %47 = vector.load %arg7[%c0_21, %c0_22] : memref<1x32xf32, #tpu.memory_space<vmem>>, vector<1x32xf32>
    %48 = vector.broadcast %47 : vector<1x32xf32> to vector<34x32xf32>
    %49 = arith.addf %46, %48 : vector<34x32xf32>
    %50 = arith.addf %0, %49 : vector<34x32xf32>
    %c0_23 = arith.constant 0 : index
    %c0_24 = arith.constant 0 : index
    %51 = vector.load %arg8[%c0_23, %c0_24] : memref<34x32xf32, #tpu.memory_space<vmem>>, vector<34x32xf32>
    tpu.vector_store %arg8[%c0_23, %c0_24], %50 {strides = array<i32>} : memref<34x32xf32, #tpu.memory_space<vmem>>, vector<34x32xf32>,
    return
  }
  func.func @transform_0(%arg0: i32) -> (i32, i32) {
    %c0_i32 = arith.constant 0 : i32
    %c0_i32_0 = arith.constant 0 : i32
    %c0_i32_1 = arith.constant 0 : i32
    return %c0_i32, %c0_i32_0 : i32, i32
  }
  func.func @transform_1(%arg0: i32) -> (i32, i32) {
    %c0_i32 = arith.constant 0 : i32
    %c0_i32_0 = arith.constant 0 : i32
    %c0_i32_1 = arith.constant 0 : i32
    return %c0_i32, %c0_i32_0 : i32, i32
  }
  func.func @transform_2(%arg0: i32) -> (i32, i32) {
    %c0_i32 = arith.constant 0 : i32
    %c0_i32_0 = arith.constant 0 : i32
    %c0_i32_1 = arith.constant 0 : i32
    return %c0_i32, %c0_i32_0 : i32, i32
  }
  func.func @transform_3(%arg0: i32) -> (i32, i32) {
    %c0_i32 = arith.constant 0 : i32
    %c0_i32_0 = arith.constant 0 : i32
    %c0_i32_1 = arith.constant 0 : i32
    return %c0_i32, %c0_i32_0 : i32, i32
  }
  func.func @transform_4(%arg0: i32) -> (i32, i32) {
    %c0_i32 = arith.constant 0 : i32
    %c0_i32_0 = arith.constant 0 : i32
    %c0_i32_1 = arith.constant 0 : i32
    return %c0_i32, %c0_i32_0 : i32, i32
  }
  func.func @transform_5(%arg0: i32) -> (i32, i32) {
    %c0_i32 = arith.constant 0 : i32
    %c0_i32_0 = arith.constant 0 : i32
    %c0_i32_1 = arith.constant 0 : i32
    return %c0_i32, %c0_i32_0 : i32, i32
  }
  func.func @transform_6(%arg0: i32) -> (i32, i32) {
    %c0_i32 = arith.constant 0 : i32
    %c0_i32_0 = arith.constant 0 : i32
    %c0_i32_1 = arith.constant 0 : i32
    return %c0_i32, %c0_i32_0 : i32, i32
  }
  func.func @transform_7(%arg0: i32) -> (i32, i32) {
    %c0_i32 = arith.constant 0 : i32
    %c0_i32_0 = arith.constant 0 : i32
    %c0_i32_1 = arith.constant 0 : i32
    return %c0_i32, %c0_i32_0 : i32, i32
  }
}

</mosaic_0001>

<bundles_post_ra>
// kernel: lora_model_forward.10
= control target key start
LH: loop header
LB: loop body
LE: loop exit
PB: predicated region body
PF: predicated region fallthrough
CT: control target
= control target key end

     0   :  { %vm26_vm0 = vcmask 261120   ;;  %vm39_vm1 = vcmask 254976   ;;  %v267_v35 = vmov 0.0   ;;  %vm268_vm2 = vmmov 0   ;;  %s379_s0 = inlined_call_operand.vmem [shape: f32[34,32], index: 0, kind: input, shape index: {}]   ;;  %s380_s3 = inlined_call_operand.vmem [shape: bf16[32,96], index: 3, kind: input, shape index: {}]   ;;  %s381_s1 = inlined_call_operand.vmem [shape: f32[1,32], index: 1, kind: input, shape index: {}]   ;;  %s382_s2 = inlined_call_operand.vmem [shape: f32[1,32], index: 2, kind: input, shape index: {}]   ;;  %s383_s4 = inlined_call_operand.vmem [shape: f32[1,96], index: 4, kind: input, shape index: {}]   ;;  %s384_s5 = inlined_call_operand.vmem [shape: f32[34,96], index: 5, kind: output, shape index: {}]  }
   0x1   :  { %v23_v0 = vld [vmem:[%s379_s0 + $0x10] sm:$0xff]  ;;  %v24_v1 = vld [vmem:[%s379_s0 + $0x18] sm:$0xff]  ;;  %v21_v2 = vld [vmem:[%s379_s0] sm:$0xff]  ;;  %249 = vmatprep.subr.bf16.mxu1 %v267_v35  ;;  %233 = vmatprep.subr.bf16.mxu0 %v267_v35  ;;  %vm209_vm3 = vcmask 785408   ;;  %vm214_vm4 = vcmask 779264  }
   0x2   :  { %v33_v3 = vsel %vm26_vm0, %v23_v0, 0.0  ;;  %v27_v4 = vsel %vm26_vm0, %v21_v2, 0.0  ;;  %v22_v5 = vld [vmem:[%s379_s0 + $0x8] sm:$0xff]  ;;  %v36_v6 = vsel %vm26_vm0, %v24_v1, 0.0  ;;  %v25_v8 = vld [vmem:[%s379_s0 + $0x20] sm:$0x3]  ;;  %241 = vmatprep.mubr.msk.bf16.mxu1 %vm268_vm2, %v267_v35  ;;  %237 = vmatprep.mubr.msk.bf16.mxu0 %vm268_vm2, %v267_v35 }
   0x3   :  { %34 = vadd.xlane.f32.xlu0 %v33_v3  ;;  %28 = vadd.xlane.f32.xlu1 %v27_v4  ;;  %v30_v7 = vsel %vm26_vm0, %v22_v5, 0.0  ;;  %v40_v9 = vsel %vm39_vm1, %v25_v8, 0.0  ;;  %v255_v36 = vld [vmem:[%s380_s3 + $0x8] sm:$0xff]   ;;  %v256_v37 = vld [vmem:[%s380_s3] sm:$0xff]  }
   0x4   :  { %251 = vmatpush3.bf16.msra.mxu1 %v255_v36  ;;  %234 = vmatpush3.bf16.msra.mxu0 %v255_v36  ;;  %v220_v55 = vld [vmem:[%s381_s1] ss:$0 sm:$0xff] }
   0x5   :  { %250 = vmatprep.subr.bf16.mxu1 %v267_v35  ;;  %235 = vmatprep.subr.bf16.mxu0 %v267_v35  ;;  %v221_v60 = vld [vmem:[%s382_s2] ss:$0 sm:$0xff] }
   0x7   :  { %37 = vadd.xlane.f32.xlu0 %v36_v6  ;;  %31 = vadd.xlane.f32.xlu1 %v30_v7 }
   0x8   :  { %252 = vmatpush3.bf16.msra.mxu1 %v256_v37  ;;  %236 = vmatpush3.bf16.msra.mxu0 %v256_v37 }
   0xb   :  { %41 = vadd.xlane.f32.xlu0 %v40_v9 }
  0x8c   :  { %v35_v10 = vpop.xlane.xlu0 %34  ;;  %v29_v11 = vpop.xlane.xlu1 %28 }
  0x8d   :  { %v46_v12 = vmul.f32 0.03125, %v35_v10  ;;  %v44_v13 = vmul.f32 0.03125, %v29_v11 }
  0x8f   :  { %v319_v14 = vsub.f32 %v23_v0, %v46_v12  ;;  %v321_v15 = vsub.f32 %v21_v2, %v44_v13 }
  0x90   :  { %v38_v16 = vpop.xlane.xlu0 %37  ;;  %v32_v17 = vpop.xlane.xlu1 %31 }
  0x91   :  { %v47_v18 = vmul.f32 0.03125, %v38_v16  ;;  %v56_v19 = vmul.f32 %v319_v14, %v319_v14  ;;  %v45_v20 = vmul.f32 0.03125, %v32_v17  ;;  %v54_v21 = vmul.f32 %v321_v15, %v321_v15 }
  0x93   :  { %v52_v22 = vsub.f32 %v24_v1, %v47_v18  ;;  %v65_v23 = vsel %vm26_vm0, %v56_v19, 0.0  ;;  %v328_v24 = vsub.f32 %v22_v5, %v45_v20  ;;  %v59_v28 = vsel %vm26_vm0, %v54_v21, 0.0 }
  0x94   :  { %v42_v25 = vpop.xlane.xlu0 %41  ;;  %66 = vadd.xlane.f32.xlu1 %v65_v23 }
  0x95   :  { %v48_v26 = vmul.f32 0.03125, %v42_v25  ;;  %v57_v27 = vmul.f32 %v52_v22, %v52_v22  ;;  %v55_v29 = vmul.f32 %v328_v24, %v328_v24 }
  0x97   :  { %v53_v30 = vsub.f32 %v25_v8, %v48_v26  ;;  %v68_v31 = vsel %vm26_vm0, %v57_v27, 0.0  ;;  %v62_v33 = vsel %vm26_vm0, %v55_v29, 0.0 }
  0x98   :  { %69 = vadd.xlane.f32.xlu0 %v68_v31  ;;  %60 = vadd.xlane.f32.xlu1 %v59_v28 }
  0x99   :  { %v58_v32 = vmul.f32 %v53_v30, %v53_v30 }
  0x9b   :  { %v71_v34 = vsel %vm39_vm1, %v58_v32, 0.0 }
  0x9c   :  { %72 = vadd.xlane.f32.xlu1 %v71_v34  ;;  %63 = vadd.xlane.f32.xlu0 %v62_v33 }
 0x11d   :  { %v67_v38 = vpop.xlane.xlu1 %66 }
 0x11e   :  { %v76_v39 = vmul.f32 0.03125, %v67_v38 }
 0x120   :  { %v81_v40 = vadd.f32 1e-06, %v76_v39 }
 0x121   :  { %v70_v41 = vpop.xlane.xlu0 %69  ;;  %v61_v42 = vpop.xlane.xlu1 %60 }
 0x122   :  { %257 = vrsqrt.f32 %v81_v40  ;;  %v77_v43 = vmul.f32 0.03125, %v70_v41  ;;  %v74_v44 = vmul.f32 0.03125, %v61_v42 }
 0x124   :  { %v82_v45 = vadd.f32 1e-06, %v77_v43  ;;  %v79_v46 = vadd.f32 1e-06, %v74_v44 }
 0x125   :  { %v64_v47 = vpop.xlane.xlu0 %63  ;;  %v73_v48 = vpop.xlane.xlu1 %72 }
 0x126   :  { %259 = vrsqrt.f32 %v82_v45  ;;  %v75_v49 = vmul.f32 0.03125, %v64_v47  ;;  %v78_v50 = vmul.f32 0.03125, %v73_v48 }
 0x127   :  { %261 = vrsqrt.f32 %v79_v46 }
 0x128   :  { %v80_v51 = vadd.f32 1e-06, %v75_v49  ;;  %v83_v52 = vadd.f32 1e-06, %v78_v50 }
 0x12a   :  { %263 = vrsqrt.f32 %v80_v51 }
 0x12b   :  { %265 = vrsqrt.f32 %v83_v52 }
 0x12f   :  { %v258_v53 = vpop.eup %257 }
 0x130   :  { %v91_v54 = vmul.f32 %v258_v53, %v319_v14  ;;  %v222_v14 = vld [vmem:[%s383_s4] ss:$0 sm:$0xff] }
 0x132   :  { %v103_v59 = vmul.f32 %v220_v55, %v91_v54 }
 0x133   :  { %v260_v56 = vpop.eup %259 }
 0x134   :  { %v262_v57 = vpop.eup %261  ;;  %v92_v58 = vmul.f32 %v260_v56, %v52_v22  ;;  %v115_v1 = vadd.f32 %v221_v60, %v103_v59 }
 0x135   :  { %v89_v61 = vmul.f32 %v262_v57, %v321_v15 }
 0x136   :  { %v104_v62 = vmul.f32 %v220_v55, %v92_v58 }
 0x137   :  { %v264_v63 = vpop.eup %263  ;;  %v101_v4 = vmul.f32 %v220_v55, %v89_v61 }
 0x138   :  { %v266_v0 = vpop.eup %265  ;;  %v116_v2 = vadd.f32 %v221_v60, %v104_v62  ;;  %v90_v3 = vmul.f32 %v264_v63, %v328_v24 }
 0x139   :  { %v93_v5 = vmul.f32 %v266_v0, %v53_v30  ;;  %v113_v9 = vadd.f32 %v221_v60, %v101_v4 }
 0x13a   :  { %v119_v6 = vpack.c.bf16 %v116_v2, %v115_v1  ;;  %v102_v7 = vmul.f32 %v220_v55, %v90_v3 }
 0x13b   :  { %v105_v8 = vmul.f32 %v220_v55, %v93_v5 }
 0x13c   :  { %242 = vmatmul.mubr.msk.bf16.vlgmr.msra.gmra.mxu1 %vm26_vm0, %v119_v6  ;;  %v114_v10 = vadd.f32 %v221_v60, %v102_v7 }
 0x13d   :  { %245 = vmatprep.mubr.msk.bf16.mxu1 %vm268_vm2, %v267_v35  ;;  %v117_v12 = vadd.f32 %v221_v60, %v105_v8 }
 0x13e   :  { %v118_v11 = vpack.c.bf16 %v114_v10, %v113_v9 }
 0x13f   :  { %v120_v13 = vpack.c.bf16 %v117_v12, %v117_v12 }
 0x140   :  { %238 = vmatmul.mubr.msk.bf16.vlgmr.msra.gmra.mxu0 %vm26_vm0, %v118_v11 }
 0x144   :  { %246 = vmatmul.mubr.msk.bf16.gmra.mxu1 %vm26_vm0, %v120_v13 }
 0x1fc   :  { %v195_v15 = vpop.f32.mrf.mxu1 }
 0x1fd   :  { %v196_v16 = vadd.f32 %v222_v14, %v195_v15 }
 0x1fe   :  { %v243_v17 = vpop.f32.mrf.mxu1 }
 0x1ff   :  { %212 = vst.msk [vmem:[%s384_s5 + $0x10] sm:$0xff] %vm209_vm3, %v196_v16 }
 0x200   :  { %v187_v18 = vpop.f32.mrf.mxu0  ;;  %v198_v19 = vpop.f32.mrf.mxu1 }
 0x201   :  { %v188_v20 = vadd.f32 %v222_v14, %v187_v18  ;;  %v199_v21 = vadd.f32 %v222_v14, %v198_v19 }
 0x202   :  { %v239_v22 = vpop.f32.mrf.mxu0  ;;  %v244_v23 = vpop.f32.mrf.mxu1 }
 0x203   :  { %210 = vst.msk [vmem:[%s384_s5] sm:$0xff] %vm209_vm3, %v188_v20  ;;  %213 = vst.msk [vmem:[%s384_s5 + $0x18] sm:$0xff] %vm209_vm3, %v199_v21 }
 0x204   :  { %v190_v24 = vpop.f32.mrf.mxu0  ;;  %v203_v25 = vpop.f32.mrf.mxu1 }
 0x205   :  { %v191_v26 = vadd.f32 %v222_v14, %v190_v24  ;;  %v204_v27 = vadd.f32 %v222_v14, %v203_v25 }
 0x206   :  { %v240_v28 = vpop.f32.mrf.mxu0  ;;  %v247_v29 = vpop.f32.mrf.mxu1 }
 0x207   :  { %211 = vst.msk [vmem:[%s384_s5 + $0x8] sm:$0xff] %vm209_vm3, %v191_v26 }
 0x208   :  { %215 = vst.msk [vmem:[%s384_s5 + $0x20] sm:$0x3] %vm214_vm4, %v204_v27  ;;  %v206_v30 = vpop.f32.mrf.mxu1 }
 0x20a   :  { %v248_v31 = vpop.f32.mrf.mxu1 }

// kernel: lora_model_forward.9
= control target key start
LH: loop header
LB: loop body
LE: loop exit
PB: predicated region body
PF: predicated region fallthrough
CT: control target
= control target key end

     0   :  { %vm52_vm0 = vcmask 392192   ;;  %vm108_vm1 = vcmask 261120   ;;  %s197_s1 = inlined_call_operand.vmem [shape: bf16[48,32], index: 1, kind: input, shape index: {}]   ;;  %s198_s0 = inlined_call_operand.vmem [shape: f32[32,48], index: 0, kind: input, shape index: {}]   ;;  %s199_s2 = inlined_call_operand.vmem [shape: f32[1,32], index: 2, kind: input, shape index: {}]   ;;  %s200_s3 = inlined_call_operand.vmem [shape: f32[32,32], index: 3, kind: output, shape index: {}]  }
   0x1   :  { %v138_v0 = vld [vmem:[%s197_s1 + $0x10] sm:$0xff]   ;;  %v139_v1 = vld [vmem:[%s197_s1 + $0x8] sm:$0xff]   ;;  %v15_v2 = vld [vmem:[%s198_s0] sm:$0xff] }
   0x2   :  { %128 = vmatprep.subr.bf16.mxu0 %v138_v0  ;;  %v16_v3 = vld [vmem:[%s198_s0 + $0x8] sm:$0xff]  ;;  %v140_v4 = vld [vmem:[%s197_s1] sm:$0xff]   ;;  %v17_v6 = vld [vmem:[%s198_s0 + $0x10] sm:$0xff] }
   0x3   :  { %129 = vmatpush3.bf16.msra.mxu0 %v138_v0  ;;  %v19_v5 = vpack.c.bf16 %v16_v3, %v15_v2  ;;  %v18_v7 = vld [vmem:[%s198_s0 + $0x18] sm:$0xff]  ;;  %v117_v9 = vld [vmem:[%s199_s2] ss:$0 sm:$0xff] }
   0x4   :  { %130 = vmatprep.subr.bf16.mxu0 %v139_v1  ;;  %v20_v8 = vpack.c.bf16 %v18_v7, %v17_v6 }
   0x5   :  { %134 = vmatprep.mubr.msk.bf16.mxu0 %vm52_vm0, %v19_v5 }
   0x7   :  { %131 = vmatpush3.bf16.msra.mxu0 %v139_v1 }
   0x8   :  { %132 = vmatprep.subr.bf16.mxu0 %v140_v4 }
   0xb   :  { %133 = vmatpush3.bf16.msra.mxu0 %v140_v4 }
   0xe   :  { %135 = vmatmul.mubr.msk.bf16.vlgmr.msra.gmra.mxu0 %vm52_vm0, %v20_v8 }
  0xce   :  { %v136_v10 = vpop.f32.mrf.mxu0 }
  0xcf   :  { %v102_v11 = vadd.f32 %v136_v10, %v117_v9 }
  0xd0   :  { %v93_v12 = vpop.f32.mrf.mxu0 }
  0xd1   :  { %111 = vst.msk [vmem:[%s200_s3 + $0x10] sm:$0xff] %vm108_vm1, %v102_v11  ;;  %v94_v13 = vadd.f32 %v117_v9, %v93_v12 }
  0xd2   :  { %v137_v14 = vpop.f32.mrf.mxu0 }
  0xd3   :  { %109 = vst.msk [vmem:[%s200_s3] sm:$0xff] %vm108_vm1, %v94_v13  ;;  %v105_v15 = vadd.f32 %v137_v14, %v117_v9 }
  0xd4   :  { %v96_v16 = vpop.f32.mrf.mxu0 }
  0xd5   :  { %112 = vst.msk [vmem:[%s200_s3 + $0x18] sm:$0xff] %vm108_vm1, %v105_v15  ;;  %v97_v17 = vadd.f32 %v117_v9, %v96_v16 }
  0xd7   :  { %110 = vst.msk [vmem:[%s200_s3 + $0x8] sm:$0xff] %vm108_vm1, %v97_v17 }

// kernel: lora_model_forward.11
= control target key start
LH: loop header
LB: loop body
LE: loop exit
PB: predicated region body
PF: predicated region fallthrough
CT: control target
= control target key end

     0   :  { %s1208_s12 = smov 0   ;;  %s1407_s0 = inlined_call_operand.vmem [shape: f32[2,4,17,8], index: 0, kind: input, shape index: {}]   ;;  %s1408_s1 = inlined_call_operand.vmem [shape: f32[2,4,17,8], index: 1, kind: input, shape index: {}]   ;;  %s1409_s2 = inlined_call_operand.vmem [shape: f32[2,4,17,8], index: 2, kind: input, shape index: {}]   ;;  %s1410_s3 = inlined_call_operand.vmem [shape: f32[2,4,17,8], index: 3, kind: output, shape index: {}]  }
   0x1 LB: > { %s990_s13 = sadd.s32 4294967295, %s1185_s12   ;;  %p994_p0 = scmp.ge.s32.totalorder %s1185_s12, 1  ;;  %s1185_s12 = sphi %s1208_s12, %s13_s12  }
   0x2   : > { %p157_p1 = scmp.lt.s32.totalorder %s1185_s12, 3 }
   0x4   : > { %p158_p2 = pnand %p994_p0, %p157_p1 }
   0x5   : > { %p191_p3 = scmp.lt.s32.totalorder (!%p158_p2), %s990_s13, 1 }
   0x6   : > { %161 = sbr.rel (%p158_p2) target bundleno = 774 (0x306), region = 32 }
   0xb   : > { %s1412_s13 = smov (!%p191_p3, %s990_s13), 1  ;;  %vm272_vm0 = vcmask 64512   ;;  %vm532_vm1 = vcmask 131072   ;;  %vm525_vm2 = vcmask 138240   ;;  %vm673_vm3 = vcmask 1040384  }
   0xc   : > { %s1216_s14 = smul.u32 96, %s1412_s13  ;;  %vm900_vm4 = vcmask 57344  }
   0xe   : > { %s1222_s17 = scalar_lea.vmem %s1408_s1, %s1216_s14  ;;  %s1228_s20 = scalar_lea.vmem %s1407_s0, %s1216_s14 }
   0xf   : > { %v234_v0 = vld [vmem:[%s1222_s17 + $0x10] sm:$0x1]  ;;  %v237_v1 = vld [vmem:[%s1222_s17 + $0x28] sm:$0x1]  ;;  %v232_v2 = vld [vmem:[%s1222_s17] sm:$0xff]  ;;  %s1348_s23 = scalar_lea.vmem %s1409_s2, %s1216_s14  ;;  %s210_s26 = scalar_lea.vmem %s1410_s3, %s1216_s14 }
  0x10   : > { %v245_v3 = vpack.c.bf16 %v234_v0, %v234_v0  ;;  %v247_v4 = vpack.c.bf16 %v237_v1, %v237_v1  ;;  %v233_v5 = vld [vmem:[%s1222_s17 + $0x8] sm:$0xff]  ;;  %v235_v6 = vld [vmem:[%s1222_s17 + $0x18] sm:$0xff]  ;;  %v236_v7 = vld [vmem:[%s1222_s17 + $0x20] sm:$0xff] }
  0x11   : > { %v244_v8 = vpack.c.bf16 %v233_v5, %v232_v2  ;;  %v246_v9 = vpack.c.bf16 %v236_v7, %v235_v6  ;;  %v212_v10 = vld [vmem:[%s1228_s20] sm:$0xff]  ;;  %v213_v11 = vld [vmem:[%s1228_s20 + $0x8] sm:$0xff]  ;;  %v215_v12 = vld [vmem:[%s1228_s20 + $0x18] sm:$0xff] }
  0x12   : > { %1113 = vmatprep.subr.msk.bf16.mxu0 %vm272_vm0, %v245_v3  ;;  %1115 = vmatprep.subr.msk.bf16.mxu1 %vm272_vm0, %v247_v4  ;;  %v283_v13 = vsel %vm272_vm0, %v245_v3, 0  ;;  %v343_v14 = vsel %vm272_vm0, %v247_v4, 0  ;;  %v224_v15 = vpack.c.bf16 %v213_v11, %v212_v10  ;;  %v216_v16 = vld [vmem:[%s1228_s20 + $0x20] sm:$0xff]  ;;  %v243_v19 = vld [vmem:[%s1222_s17 + $0x58] sm:$0x1]  ;;  %v238_v26 = vld [vmem:[%s1222_s17 + $0x30] sm:$0xff] }
  0x13   : > { %1050 = vmatpush3.bf16.xpose.msra.mxu0 %v283_v13  ;;  %1058 = vmatpush3.bf16.xpose.msra.mxu1 %v343_v14  ;;  %v226_v17 = vpack.c.bf16 %v216_v16, %v215_v12  ;;  %v240_v18 = vld [vmem:[%s1222_s17 + $0x40] sm:$0x1]  ;;  %v280_v20 = vsel %vm272_vm0, %v244_v8, 0  ;;  %v340_v21 = vsel %vm272_vm0, %v246_v9, 0  ;;  %v251_v23 = vpack.c.bf16 %v243_v19, %v243_v19  ;;  %v214_v24 = vld [vmem:[%s1228_s20 + $0x10] sm:$0x1] }
  0x14   : > { %1114 = vmatprep.subr.msk.bf16.mxu0 %vm272_vm0, %v244_v8  ;;  %1116 = vmatprep.subr.msk.bf16.mxu1 %vm272_vm0, %v246_v9  ;;  %v249_v22 = vpack.c.bf16 %v240_v18, %v240_v18  ;;  %v217_v25 = vld [vmem:[%s1228_s20 + $0x28] sm:$0x1]  ;;  %v239_v27 = vld [vmem:[%s1222_s17 + $0x38] sm:$0xff]  ;;  %v242_v29 = vld [vmem:[%s1222_s17 + $0x50] sm:$0xff]  ;;  %v225_v31 = vpack.c.bf16 %v214_v24, %v214_v24 }
  0x15   : > { %1053 = vmatprep.mubr.msk.bf16.mxu0 %vm272_vm0, %v224_v15  ;;  %1061 = vmatprep.mubr.msk.bf16.mxu1 %vm272_vm0, %v226_v17  ;;  %v241_v28 = vld [vmem:[%s1222_s17 + $0x48] sm:$0xff]  ;;  %v218_v30 = vld [vmem:[%s1228_s20 + $0x30] sm:$0xff]  ;;  %v227_v32 = vpack.c.bf16 %v217_v25, %v217_v25  ;;  %v219_v33 = vld [vmem:[%s1228_s20 + $0x38] sm:$0xff]  ;;  %v463_v37 = vsel %vm272_vm0, %v251_v23, 0  ;;  %v248_v38 = vpack.c.bf16 %v239_v27, %v238_v26 }
  0x16   : > { %v221_v34 = vld [vmem:[%s1228_s20 + $0x48] sm:$0xff]  ;;  %v222_v35 = vld [vmem:[%s1228_s20 + $0x50] sm:$0xff]  ;;  %v403_v36 = vsel %vm272_vm0, %v249_v22, 0  ;;  %v250_v39 = vpack.c.bf16 %v242_v29, %v241_v28  ;;  %v228_v40 = vpack.c.bf16 %v219_v33, %v218_v30  ;;  %v220_v44 = vld [vmem:[%s1228_s20 + $0x40] sm:$0x1] }
  0x17   : > { %v230_v41 = vpack.c.bf16 %v222_v35, %v221_v34  ;;  %v400_v42 = vsel %vm272_vm0, %v248_v38, 0  ;;  %v223_v45 = vld [vmem:[%s1228_s20 + $0x58] sm:$0x1]  ;;  %v229_v46 = vpack.c.bf16 %v220_v44, %v220_v44 }
  0x18   : > { %v460_v43 = vsel %vm272_vm0, %v250_v39, 0  ;;  %v231_v47 = vpack.c.bf16 %v223_v45, %v223_v45 }
  0x1b   : > { %1052 = vmatpush3.bf16.xpose.msra.mxu0 %v280_v20  ;;  %1060 = vmatpush3.bf16.xpose.msra.mxu1 %v340_v21 }
  0x1c   : > { %1117 = vmatprep.subr.msk.bf16.mxu0 %vm272_vm0, %v249_v22  ;;  %1119 = vmatprep.subr.msk.bf16.mxu1 %vm272_vm0, %v251_v23 }
  0x22   : > { %1054 = vmatmul.mubr.msk.bf16.vlgmr.msra.gmra.mxu0 %vm272_vm0, %v225_v31  ;;  %1062 = vmatmul.mubr.msk.bf16.vlgmr.msra.gmra.mxu1 %vm272_vm0, %v227_v32 }
  0x23   : > { %1066 = vmatpush3.bf16.xpose.msra.mxu0 %v403_v36  ;;  %1074 = vmatpush3.bf16.xpose.msra.mxu1 %v463_v37 }
  0x24   : > { %1118 = vmatprep.subr.msk.bf16.mxu0 %vm272_vm0, %v248_v38  ;;  %1120 = vmatprep.subr.msk.bf16.mxu1 %vm272_vm0, %v250_v39 }
  0x25   : > { %1069 = vmatprep.mubr.msk.bf16.mxu0 %vm272_vm0, %v228_v40  ;;  %1077 = vmatprep.mubr.msk.bf16.mxu1 %vm272_vm0, %v230_v41 }
  0x2b   : > { %1068 = vmatpush3.bf16.xpose.msra.mxu0 %v400_v42  ;;  %1076 = vmatpush3.bf16.xpose.msra.mxu1 %v460_v43 }
  0x32   : > { %1070 = vmatmul.mubr.msk.bf16.vlgmr.msra.gmra.mxu0 %vm272_vm0, %v229_v46  ;;  %1078 = vmatmul.mubr.msk.bf16.vlgmr.msra.gmra.mxu1 %vm272_vm0, %v231_v47 }
  0xe2   : > { %v1055_v48 = vpop.f32.mrf.mxu0  ;;  %v1063_v49 = vpop.f32.mrf.mxu1 }
  0xe3   : > { %v515_v50 = vmul.f32 0.35355338, %v1055_v48  ;;  %v518_v51 = vmul.f32 0.35355338, %v1063_v49 }
  0xe4   : > { %v319_v52 = vpop.f32.mrf.mxu0  ;;  %v379_v53 = vpop.f32.mrf.mxu1 }
  0xe5   : > { %v513_v54 = vmul.f32 0.35355338, %v319_v52  ;;  %v516_v55 = vmul.f32 0.35355338, %v379_v53  ;;  %v542_v56 = vsel %vm532_vm1, %v518_v51, -inf  ;;  %v533_v57 = vsel %vm532_vm1, %v515_v50, -inf }
  0xe6   : > { %543 = vmax.xlane.f32.xlu1 %v542_v56  ;;  %v1064_v58 = vpop.f32.mrf.mxu1  ;;  %534 = vmax.xlane.f32.xlu0 %v533_v57  ;;  %v1056_v59 = vpop.f32.mrf.mxu0 }
  0xe7   : > { %v536_v60 = vsel %vm525_vm2, %v516_v55, -inf  ;;  %v526_v1 = vsel %vm525_vm2, %v513_v54, -inf }
  0xe8   : > { %v322_v61 = vpop.f32.mrf.mxu0  ;;  %v382_v62 = vpop.f32.mrf.mxu1 }
  0xe9   : > { %v514_v63 = vmul.f32 0.35355338, %v322_v61  ;;  %v517_v0 = vmul.f32 0.35355338, %v382_v62 }
  0xea   : > { %537 = vmax.xlane.f32.xlu1 %v536_v60  ;;  %527 = vmax.xlane.f32.xlu0 %v526_v1 }
  0xeb   : > { %v539_v2 = vsel %vm525_vm2, %v517_v0, -inf  ;;  %v529_v3 = vsel %vm525_vm2, %v514_v63, -inf }
  0xee   : > { %540 = vmax.xlane.f32.xlu1 %v539_v2  ;;  %530 = vmax.xlane.f32.xlu0 %v529_v3 }
  0xf2   : > { %v1071_v4 = vpop.f32.mrf.mxu0  ;;  %v1079_v5 = vpop.f32.mrf.mxu1 }
  0xf3   : > { %v1285_v16 = vmul.f32 0.35355338, %v1071_v4  ;;  %v1291_v20 = vmul.f32 0.35355338, %v1079_v5 }
  0xf4   : > { %v439_v6 = vpop.f32.mrf.mxu0  ;;  %v499_v7 = vpop.f32.mrf.mxu1 }
  0xf5   : > { %v519_v8 = vmul.f32 0.35355338, %v439_v6  ;;  %v522_v11 = vmul.f32 0.35355338, %v499_v7  ;;  %v551_v21 = vsel %vm532_vm1, %v1285_v16, -inf  ;;  %v560_v23 = vsel %vm532_vm1, %v1291_v20, -inf }
  0xf6   : > { %v1072_v9 = vpop.f32.mrf.mxu0  ;;  %v1080_v10 = vpop.f32.mrf.mxu1 }
  0xf7   : > { %v545_v12 = vsel %vm525_vm2, %v519_v8, -inf  ;;  %v554_v18 = vsel %vm525_vm2, %v522_v11, -inf }
  0xf8   : > { %v502_v13 = vpop.f32.mrf.mxu1  ;;  %546 = vmax.xlane.f32.xlu0 %v545_v12  ;;  %v442_v14 = vpop.f32.mrf.mxu0 }
  0xf9   : > { %v520_v15 = vmul.f32 0.35355338, %v442_v14  ;;  %v1287_v17 = vmul.f32 0.35355338, %v502_v13 }
  0xfb   : > { %v548_v19 = vsel %vm525_vm2, %v520_v15, -inf  ;;  %v557_v22 = vsel %vm525_vm2, %v1287_v17, -inf }
  0xfc   : > { %555 = vmax.xlane.f32.xlu0 %v554_v18  ;;  %549 = vmax.xlane.f32.xlu1 %v548_v19  ;;  %v254_v18 = vld [vmem:[%s1348_s23 + $0x10] sm:$0x1] }
  0xfd   : > { %v265_v19 = vpack.c.bf16 %v254_v18, %v254_v18 }
 0x100   : > { %552 = vmax.xlane.f32.xlu0 %v551_v21  ;;  %558 = vmax.xlane.f32.xlu1 %v557_v22  ;;  %v1187_v21 = vmov 0  }
 0x101   : > { %v675_v22 = vsel %vm673_vm3, 65535, %v1187_v21 }
 0x104   : > { %561 = vmax.xlane.f32.xlu1 %v560_v23 }
 0x16f   : > { %v544_v24 = vpop.xlane.xlu1 %543  ;;  %v535_v25 = vpop.xlane.xlu0 %534 }
 0x170   : > { %v568_v26 = vsub.f32 %v518_v51, %v544_v24  ;;  %v565_v27 = vsub.f32 %v515_v50, %v535_v25  ;;  %v677_v24 = vand.u32 %v675_v22, %v265_v19  ;;  %v257_v25 = vld [vmem:[%s1348_s23 + $0x28] sm:$0x1] }
 0x172   : > { %v585_v28 = vmul.f32 1.442695, %v568_v26  ;;  %v579_v29 = vmul.f32 1.442695, %v565_v27  ;;  %1081 = vmatprep.subr.bf16.mxu0 %v677_v24  ;;  %v267_v26 = vpack.c.bf16 %v257_v25, %v257_v25  ;;  %v252_v27 = vld [vmem:[%s1348_s23] sm:$0xff] }
 0x173   : > { %v538_v30 = vpop.xlane.xlu1 %537  ;;  %v528_v31 = vpop.xlane.xlu0 %527  ;;  %1082 = vmatpush3.bf16.msra.mxu0 %v677_v24 }
 0x174   : > { %1131 = vpow2.f32 %v585_v28  ;;  %v566_v32 = vsub.f32 %v516_v55, %v538_v30  ;;  %v563_v33 = vsub.f32 %v513_v54, %v528_v31  ;;  %v253_v28 = vld [vmem:[%s1348_s23 + $0x8] sm:$0xff]  ;;  %v734_v30 = vand.u32 %v675_v22, %v267_v26  ;;  %v255_v31 = vld [vmem:[%s1348_s23 + $0x18] sm:$0xff] }
 0x175   : > { %1133 = vpow2.f32 %v579_v29  ;;  %v264_v29 = vpack.c.bf16 %v253_v28, %v252_v27 }
 0x176   : > { %v575_v34 = vmul.f32 1.442695, %v563_v33  ;;  %v581_v35 = vmul.f32 1.442695, %v566_v32  ;;  %1089 = vmatprep.subr.bf16.mxu1 %v734_v30  ;;  %v256_v32 = vld [vmem:[%s1348_s23 + $0x20] sm:$0xff] }
 0x177   : > { %v541_v36 = vpop.xlane.xlu1 %540  ;;  %v531_v37 = vpop.xlane.xlu0 %530  ;;  %1083 = vmatprep.subr.bf16.mxu0 %v264_v29  ;;  %1090 = vmatpush3.bf16.msra.mxu1 %v734_v30  ;;  %v266_v33 = vpack.c.bf16 %v256_v32, %v255_v31 }
 0x178   : > { %v567_v38 = vsub.f32 %v517_v0, %v541_v36  ;;  %v564_v39 = vsub.f32 %v514_v63, %v531_v37  ;;  %1135 = vpow2.f32 %v575_v34  ;;  %1084 = vmatpush3.bf16.msra.mxu0 %v264_v29  ;;  %v260_v34 = vld [vmem:[%s1348_s23 + $0x40] sm:$0x1] }
 0x179   : > { %1137 = vpow2.f32 %v581_v35  ;;  %1091 = vmatprep.subr.bf16.mxu1 %v266_v33  ;;  %v263_v35 = vld [vmem:[%s1348_s23 + $0x58] sm:$0x1]  ;;  %v269_v36 = vpack.c.bf16 %v260_v34, %v260_v34 }
 0x17a   : > { %v577_v40 = vmul.f32 1.442695, %v564_v39  ;;  %v583_v41 = vmul.f32 1.442695, %v567_v38  ;;  %v271_v37 = vpack.c.bf16 %v263_v35, %v263_v35 }
 0x17b   : > { %1092 = vmatpush3.bf16.msra.mxu1 %v266_v33  ;;  %v791_v38 = vand.u32 %v675_v22, %v269_v36 }
 0x17c   : > { %1139 = vpow2.f32 %v577_v40  ;;  %v848_v39 = vand.u32 %v675_v22, %v271_v37 }
 0x17d   : > { %1141 = vpow2.f32 %v583_v41  ;;  %1097 = vmatprep.subr.bf16.mxu0 %v791_v38 }
 0x17e   : > { %1105 = vmatprep.subr.bf16.mxu1 %v848_v39 }
 0x181   : > { %v1299_v42 = vpop.eup %1131  ;;  %v547_v43 = vpop.xlane.xlu0 %546 }
 0x182   : > { %v1301_v44 = vpop.eup %1133  ;;  %v569_v45 = vsub.f32 %v519_v8, %v547_v43  ;;  %v614_v46 = vsel %vm532_vm1, %v1299_v42, 0.0 }
 0x183   : > { %v605_v47 = vsel %vm532_vm1, %v1301_v44, 0.0  ;;  %615 = vadd.xlane.f32.xlu1 %v614_v46 }
 0x184   : > { %v587_v48 = vmul.f32 1.442695, %v569_v45  ;;  %606 = vadd.xlane.f32.xlu0 %v605_v47 }
 0x185   : > { %v556_v49 = vpop.xlane.xlu0 %555  ;;  %v550_v50 = vpop.xlane.xlu1 %549 }
 0x186   : > { %v1307_v51 = vpop.eup %1135  ;;  %1143 = vpow2.f32 %v587_v48  ;;  %v572_v52 = vsub.f32 %v522_v11, %v556_v49  ;;  %v570_v53 = vsub.f32 %v520_v15, %v550_v50 }
 0x187   : > { %v599_v54 = vsel %vm525_vm2, %v1307_v51, 0.0  ;;  %v1311_v55 = vpop.eup %1137 }
 0x188   : > { %v593_v56 = vmul.f32 1.442695, %v572_v52  ;;  %v589_v57 = vmul.f32 1.442695, %v570_v53  ;;  %600 = vadd.xlane.f32.xlu0 %v599_v54  ;;  %v608_v63 = vsel %vm525_vm2, %v1311_v55, 0.0 }
 0x189   : > { %v553_v58 = vpop.xlane.xlu0 %552  ;;  %v559_v59 = vpop.xlane.xlu1 %558 }
 0x18a   : > { %v1313_v60 = vpop.eup %1139  ;;  %1145 = vpow2.f32 %v593_v56  ;;  %v571_v61 = vsub.f32 %v1285_v16, %v553_v58  ;;  %v573_v62 = vsub.f32 %v1287_v17, %v559_v59  ;;  %v258_v58 = vld [vmem:[%s1348_s23 + $0x30] sm:$0xff]  ;;  %v259_v59 = vld [vmem:[%s1348_s23 + $0x38] sm:$0xff] }
 0x18b   : > { %1147 = vpow2.f32 %v589_v57  ;;  %v602_v0 = vsel %vm525_vm2, %v1313_v60, 0.0  ;;  %v1321_v1 = vpop.eup %1141 }
 0x18c   : > { %v591_v2 = vmul.f32 1.442695, %v571_v61  ;;  %v595_v3 = vmul.f32 1.442695, %v573_v62  ;;  %609 = vadd.xlane.f32.xlu0 %v608_v63  ;;  %603 = vadd.xlane.f32.xlu1 %v602_v0  ;;  %v611_v6 = vsel %vm525_vm2, %v1321_v1, 0.0 }
 0x18d   : > { %v562_v4 = vpop.xlane.xlu1 %561 }
 0x18e   : > { %1149 = vpow2.f32 %v591_v2  ;;  %v574_v5 = vsub.f32 %v1291_v20, %v562_v4 }
 0x18f   : > { %1151 = vpow2.f32 %v595_v3 }
 0x190   : > { %v597_v7 = vmul.f32 1.442695, %v574_v5  ;;  %612 = vadd.xlane.f32.xlu1 %v611_v6  ;;  %v268_v6 = vpack.c.bf16 %v259_v59, %v258_v58 }
 0x192   : > { %1153 = vpow2.f32 %v597_v7 }
 0x193   : > { %v1326_v8 = vpop.eup %1143 }
 0x194   : > { %v617_v9 = vsel %vm525_vm2, %v1326_v8, 0.0 }
 0x195   : > { %618 = vadd.xlane.f32.xlu0 %v617_v9 }
 0x197   : > { %v1330_v10 = vpop.eup %1145 }
 0x198   : > { %v1332_v11 = vpop.eup %1147  ;;  %v626_v12 = vsel %vm525_vm2, %v1330_v10, 0.0 }
 0x199   : > { %627 = vadd.xlane.f32.xlu0 %v626_v12  ;;  %v620_v13 = vsel %vm525_vm2, %v1332_v11, 0.0  ;;  %v261_v12 = vld [vmem:[%s1348_s23 + $0x48] sm:$0xff] }
 0x19a   : > { %621 = vadd.xlane.f32.xlu1 %v620_v13  ;;  %v262_v13 = vld [vmem:[%s1348_s23 + $0x50] sm:$0xff] }
 0x19b   : > { %v1338_v14 = vpop.eup %1149 }
 0x19c   : > { %v1340_v15 = vpop.eup %1151  ;;  %v623_v16 = vsel %vm532_vm1, %v1338_v14, 0.0 }
 0x19d   : > { %624 = vadd.xlane.f32.xlu0 %v623_v16  ;;  %v629_v17 = vsel %vm525_vm2, %v1340_v15, 0.0 }
 0x19e   : > { %630 = vadd.xlane.f32.xlu1 %v629_v17  ;;  %v270_v17 = vpack.c.bf16 %v262_v13, %v261_v12 }
 0x19f   : > { %v1353_v20 = vpop.eup %1153 }
 0x1a0   : > { %v632_v23 = vsel %vm532_vm1, %v1353_v20, 0.0 }
 0x1a2   : > { %633 = vadd.xlane.f32.xlu1 %v632_v23 }
 0x20c   : > { %v616_v41 = vpop.xlane.xlu1 %615 }
 0x20d   : > { %v607_v40 = vpop.xlane.xlu0 %606 }
 0x20e   : > { %1155 = vrcp.f32 %v607_v40 }
 0x211   : > { %v601_v43 = vpop.xlane.xlu0 %600 }
 0x212   : > { %1157 = vrcp.f32 %v601_v43 }
 0x213   : > { %1159 = vrcp.f32 %v616_v41 }
 0x215   : > { %v610_v45 = vpop.xlane.xlu0 %609  ;;  %v604_v46 = vpop.xlane.xlu1 %603 }
 0x216   : > { %1161 = vrcp.f32 %v604_v46 }
 0x217   : > { %1163 = vrcp.f32 %v610_v45 }
 0x219   : > { %v613_v47 = vpop.xlane.xlu1 %612 }
 0x21a   : > { %1165 = vrcp.f32 %v613_v47 }
 0x21b   : > { %v1156_v49 = vpop.eup %1155 }
 0x21c   : > { %v649_v57 = vmul.f32 %v1156_v49, %v1301_v44 }
 0x21e   : > { %v619_v48 = vpop.xlane.xlu0 %618  ;;  %v660_v44 = vpack.c.bf16 %v649_v57, %v649_v57 }
 0x21f   : > { %v1158_v50 = vpop.eup %1157  ;;  %1167 = vrcp.f32 %v619_v48 }
 0x220   : > { %v1160_v53 = vpop.eup %1159  ;;  %v647_v62 = vmul.f32 %v1158_v50, %v1307_v51 }
 0x221   : > { %v652_v5 = vmul.f32 %v1160_v53, %v1299_v42 }
 0x222   : > { %v628_v52 = vpop.xlane.xlu0 %627 }
 0x223   : > { %v622_v54 = vpop.xlane.xlu1 %621  ;;  %v1162_v56 = vpop.eup %1161  ;;  %v662_v16 = vpack.c.bf16 %v652_v5, %v652_v5 }
 0x224   : > { %1169 = vrcp.f32 %v622_v54  ;;  %v1164_v61 = vpop.eup %1163  ;;  %v648_v63 = vmul.f32 %v1162_v56, %v1313_v60 }
 0x225   : > { %1171 = vrcp.f32 %v628_v52  ;;  %v650_v7 = vmul.f32 %v1164_v61, %v1311_v55 }
 0x226   : > { %v625_v0 = vpop.xlane.xlu0 %624  ;;  %v659_v4 = vpack.c.bf16 %v648_v63, %v647_v62 }
 0x227   : > { %v1166_v2 = vpop.eup %1165  ;;  %1173 = vrcp.f32 %v625_v0  ;;  %v631_v3 = vpop.xlane.xlu1 %630 }
 0x228   : > { %1175 = vrcp.f32 %v631_v3  ;;  %v651_v9 = vmul.f32 %v1166_v2, %v1321_v1  ;;  %1085 = vmatprep.mubr.msk.bf16.mxu0 %vm525_vm2, %v659_v4 }
 0x229   : > { %1086 = vmatmul.mubr.msk.bf16.vlgmr.msra.gmra.mxu0 %vm525_vm2, %v660_v44 }
 0x22a   : > { %v661_v51 = vpack.c.bf16 %v651_v9, %v650_v7  ;;  %1098 = vmatpush3.bf16.msra.mxu0 %v791_v38 }
 0x22b   : > { %v634_v60 = vpop.xlane.xlu1 %633  ;;  %1099 = vmatprep.subr.bf16.mxu0 %v268_v6 }
 0x22c   : > { %1177 = vrcp.f32 %v634_v60  ;;  %1093 = vmatprep.mubr.msk.bf16.mxu1 %vm525_vm2, %v661_v51  ;;  %v1168_v42 = vpop.eup %1167 }
 0x22d   : > { %1094 = vmatmul.mubr.msk.bf16.vlgmr.msra.gmra.mxu1 %vm525_vm2, %v662_v16  ;;  %v653_v1 = vmul.f32 %v1168_v42, %v1326_v8 }
 0x22e   : > { %1106 = vmatpush3.bf16.msra.mxu1 %v848_v39  ;;  %1100 = vmatpush3.bf16.msra.mxu0 %v268_v6 }
 0x22f   : > { %1107 = vmatprep.subr.bf16.mxu1 %v270_v17 }
 0x231   : > { %v1170_v55 = vpop.eup %1169 }
 0x232   : > { %v654_v18 = vmul.f32 %v1170_v55, %v1332_v11  ;;  %1108 = vmatpush3.bf16.msra.mxu1 %v270_v17  ;;  %v1172_v19 = vpop.eup %1171 }
 0x233   : > { %v656_v25 = vmul.f32 %v1172_v19, %v1330_v10 }
 0x234   : > { %v1174_v21 = vpop.eup %1173  ;;  %v663_v22 = vpack.c.bf16 %v654_v18, %v653_v1 }
 0x235   : > { %v1176_v23 = vpop.eup %1175  ;;  %v655_v24 = vmul.f32 %v1174_v21, %v1338_v14 }
 0x236   : > { %1101 = vmatprep.mubr.msk.bf16.mxu0 %vm525_vm2, %v663_v22  ;;  %v657_v26 = vmul.f32 %v1176_v23, %v1340_v15 }
 0x237   : > { %v664_v27 = vpack.c.bf16 %v655_v24, %v655_v24 }
 0x238   : > { %v665_v28 = vpack.c.bf16 %v657_v26, %v656_v25 }
 0x239   : > { %v1178_v29 = vpop.eup %1177  ;;  %1102 = vmatmul.mubr.msk.bf16.vlgmr.msra.gmra.mxu0 %vm525_vm2, %v664_v27 }
 0x23a   : > { %1109 = vmatprep.mubr.msk.bf16.mxu1 %vm525_vm2, %v665_v28  ;;  %v658_v8 = vmul.f32 %v1178_v29, %v1353_v20 }
 0x23c   : > { %v666_v11 = vpack.c.bf16 %v658_v8, %v658_v8 }
 0x23e   : > { %1110 = vmatmul.mubr.msk.bf16.vlgmr.msra.gmra.mxu1 %vm525_vm2, %v666_v11 }
 0x2e9   : > { %v1087_v10 = vpop.f32.mrf.mxu0 }
 0x2ea   : > { %901 = vst.msk [vmem:[%s210_s26 + $0x10] sm:$0x1] %vm900_vm4, %v1087_v10 }
 0x2eb   : > { %v713_v14 = vpop.f32.mrf.mxu0 }
 0x2ec   : > { %898 = vst.msk [vmem:[%s210_s26] sm:$0xff] %vm272_vm0, %v713_v14 }
 0x2ed   : > { %v1095_v15 = vpop.f32.mrf.mxu1  ;;  %v1088_v30 = vpop.f32.mrf.mxu0 }
 0x2ee   : > { %904 = vst.msk [vmem:[%s210_s26 + $0x28] sm:$0x1] %vm900_vm4, %v1095_v15 }
 0x2ef   : > { %v770_v31 = vpop.f32.mrf.mxu1  ;;  %v716_v20 = vpop.f32.mrf.mxu0 }
 0x2f0   : > { %902 = vst.msk [vmem:[%s210_s26 + $0x18] sm:$0xff] %vm272_vm0, %v770_v31  ;;  %899 = vst.msk [vmem:[%s210_s26 + $0x8] sm:$0xff] %vm272_vm0, %v716_v20 }
 0x2f1   : > { %v1096_v32 = vpop.f32.mrf.mxu1 }
 0x2f3   : > { %v773_v33 = vpop.f32.mrf.mxu1 }
 0x2f4   : > { %903 = vst.msk [vmem:[%s210_s26 + $0x20] sm:$0xff] %vm272_vm0, %v773_v33 }
 0x2f9   : > { %v1103_v34 = vpop.f32.mrf.mxu0 }
 0x2fa   : > { %907 = vst.msk [vmem:[%s210_s26 + $0x40] sm:$0x1] %vm900_vm4, %v1103_v34 }
 0x2fb   : > { %v827_v35 = vpop.f32.mrf.mxu0 }
 0x2fc   : > { %905 = vst.msk [vmem:[%s210_s26 + $0x30] sm:$0xff] %vm272_vm0, %v827_v35 }
 0x2fd   : > { %v1104_v36 = vpop.f32.mrf.mxu0 }
 0x2fe   : > { %v1111_v37 = vpop.f32.mrf.mxu1 }
 0x2ff   : > { %910 = vst.msk [vmem:[%s210_s26 + $0x58] sm:$0x1] %vm900_vm4, %v1111_v37  ;;  %v830_v38 = vpop.f32.mrf.mxu0 }
 0x300   : > { %906 = vst.msk [vmem:[%s210_s26 + $0x38] sm:$0xff] %vm272_vm0, %v830_v38  ;;  %v884_v39 = vpop.f32.mrf.mxu1 }
 0x301   : > { %908 = vst.msk [vmem:[%s210_s26 + $0x48] sm:$0xff] %vm272_vm0, %v884_v39 }
 0x302   : > { %v1112_v40 = vpop.f32.mrf.mxu1 }
 0x304   : > { %v887_v41 = vpop.f32.mrf.mxu1 }
 0x305   : > { %909 = vst.msk [vmem:[%s210_s26 + $0x50] sm:$0xff] %vm272_vm0, %v887_v41 }
 0x306 PF: > { %s13_s12 = sadd.s32 1, %s1185_s12  }
 0x307   : > { %p10_p4 = scmp.ge.s32.totalorder %s13_s12, 4  }
 0x309   :  { %12 = sbr.rel (!%p10_p4) target bundleno = 1 (0x1), region = 68 }

// kernel: lora_model_forward.12
= control target key start
LH: loop header
LB: loop body
LE: loop exit
PB: predicated region body
PF: predicated region fallthrough
CT: control target
= control target key end

     0   :  { %v175_v0 = vmov 0.0   ;;  %vm176_vm0 = vmmov 0   ;;  %vm42_vm1 = vcmask 261120   ;;  %vm134_vm2 = vcmask 254976   ;;  %s266_s1 = inlined_call_operand.vmem [shape: bf16[32,32], index: 1, kind: input, shape index: {}]   ;;  %s267_s0 = inlined_call_operand.vmem [shape: f32[34,32], index: 0, kind: input, shape index: {}]   ;;  %s268_s3 = inlined_call_operand.vmem [shape: f32[34,32], index: 3, kind: input, shape index: {}, may-alias: {3,4}]   ;;  %s269_s2 = inlined_call_operand.vmem [shape: f32[1,32], index: 2, kind: input, shape index: {}]   ;;  %s270_s4 = inlined_call_operand.vmem [shape: f32[34,32], index: 4, kind: output, shape index: {}, may-alias: {3,4}]  }
   0x1   :  { %151 = vmatprep.subr.bf16.mxu0 %v175_v0  ;;  %167 = vmatprep.subr.bf16.mxu1 %v175_v0  ;;  %v173_v1 = vld [vmem:[%s266_s1 + $0x8] sm:$0xff]   ;;  %v174_v2 = vld [vmem:[%s266_s1] sm:$0xff]   ;;  %v20_v5 = vld [vmem:[%s267_s0 + $0x10] sm:$0xff] }
   0x2   :  { %155 = vmatprep.mubr.msk.bf16.mxu0 %vm176_vm0, %v175_v0  ;;  %159 = vmatprep.mubr.msk.bf16.mxu1 %vm176_vm0, %v175_v0  ;;  %v18_v3 = vld [vmem:[%s267_s0] sm:$0xff]  ;;  %v19_v4 = vld [vmem:[%s267_s0 + $0x8] sm:$0xff]  ;;  %v21_v6 = vld [vmem:[%s267_s0 + $0x18] sm:$0xff] }
   0x3   :  { %152 = vmatpush3.bf16.msra.mxu0 %v173_v1  ;;  %169 = vmatpush3.bf16.msra.mxu1 %v173_v1  ;;  %v23_v7 = vpack.c.bf16 %v19_v4, %v18_v3  ;;  %v24_v8 = vpack.c.bf16 %v21_v6, %v20_v5  ;;  %v22_v9 = vld [vmem:[%s267_s0 + $0x20] sm:$0x3]  ;;  %v110_v12 = vld [vmem:[%s268_s3 + $0x10] sm:$0xff]  ;;  %v109_v20 = vld [vmem:[%s268_s3 + $0x8] sm:$0xff] }
   0x4   :  { %153 = vmatprep.subr.bf16.mxu0 %v175_v0  ;;  %168 = vmatprep.subr.bf16.mxu1 %v175_v0  ;;  %v25_v10 = vpack.c.bf16 %v22_v9, %v22_v9  ;;  %v108_v11 = vld [vmem:[%s268_s3] sm:$0xff]  ;;  %v111_v21 = vld [vmem:[%s268_s3 + $0x18] sm:$0xff] }
   0x5   :  { %v145_v14 = vld [vmem:[%s269_s2] ss:$0 sm:$0xff] }
   0x7   :  { %154 = vmatpush3.bf16.msra.mxu0 %v174_v2  ;;  %170 = vmatpush3.bf16.msra.mxu1 %v174_v2 }
   0xa   :  { %156 = vmatmul.mubr.msk.bf16.vlgmr.msra.gmra.mxu0 %vm42_vm1, %v23_v7  ;;  %160 = vmatmul.mubr.msk.bf16.vlgmr.msra.gmra.mxu1 %vm42_vm1, %v24_v8 }
   0xb   :  { %163 = vmatprep.mubr.msk.bf16.mxu1 %vm176_vm0, %v175_v0 }
  0x12   :  { %164 = vmatmul.mubr.msk.bf16.gmra.mxu1 %vm42_vm1, %v25_v10 }
  0xca   :  { %v86_v13 = vpop.f32.mrf.mxu0  ;;  %v94_v15 = vpop.f32.mrf.mxu1 }
  0xcb   :  { %v113_v16 = vadd.f32 %v108_v11, %v86_v13  ;;  %v115_v17 = vadd.f32 %v110_v12, %v94_v15 }
  0xcc   :  { %v157_v18 = vpop.f32.mrf.mxu0  ;;  %v161_v19 = vpop.f32.mrf.mxu1 }
  0xcd   :  { %v125_v22 = vadd.f32 %v145_v14, %v113_v16  ;;  %v127_v23 = vadd.f32 %v145_v14, %v115_v17 }
  0xce   :  { %v89_v24 = vpop.f32.mrf.mxu0  ;;  %v97_v25 = vpop.f32.mrf.mxu1 }
  0xcf   :  { %130 = vst.msk [vmem:[%s270_s4] sm:$0xff] %vm42_vm1, %v125_v22  ;;  %132 = vst.msk [vmem:[%s270_s4 + $0x10] sm:$0xff] %vm42_vm1, %v127_v23  ;;  %v114_v26 = vadd.f32 %v109_v20, %v89_v24  ;;  %v116_v27 = vadd.f32 %v111_v21, %v97_v25 }
  0xd0   :  { %v158_v28 = vpop.f32.mrf.mxu0  ;;  %v162_v29 = vpop.f32.mrf.mxu1 }
  0xd1   :  { %v126_v31 = vadd.f32 %v145_v14, %v114_v26  ;;  %v128_v32 = vadd.f32 %v145_v14, %v116_v27 }
  0xd2   :  { %v102_v33 = vpop.f32.mrf.mxu1 }
  0xd4   :  { %v165_v35 = vpop.f32.mrf.mxu1 }
  0xd6   :  { %v112_v30 = vld [vmem:[%s268_s3 + $0x20] sm:$0x3]  ;;  %v105_v37 = vpop.f32.mrf.mxu1 }
  0xd7   :  { %131 = vst.msk [vmem:[%s270_s4 + $0x8] sm:$0xff] %vm42_vm1, %v126_v31  ;;  %133 = vst.msk [vmem:[%s270_s4 + $0x18] sm:$0xff] %vm42_vm1, %v128_v32  ;;  %v117_v34 = vadd.f32 %v112_v30, %v102_v33 }
  0xd8   :  { %v166_v38 = vpop.f32.mrf.mxu1 }
  0xd9   :  { %v129_v36 = vadd.f32 %v145_v14, %v117_v34 }
  0xdb   :  { %135 = vst.msk [vmem:[%s270_s4 + $0x20] sm:$0x3] %vm134_vm2, %v129_v36 }

// kernel: lora_model_forward.13
= control target key start
LH: loop header
LB: loop body
LE: loop exit
PB: predicated region body
PF: predicated region fallthrough
CT: control target
= control target key end

     0   :  { %vm32_vm0 = vcmask 261120   ;;  %vm45_vm1 = vcmask 254976   ;;  %v529_v35 = vmov 0.0   ;;  %vm530_vm2 = vmmov 0   ;;  %s731_s0 = inlined_call_operand.vmem [shape: f32[34,32], index: 0, kind: input, shape index: {}, may-alias: {0,7}]   ;;  %s732_s3 = inlined_call_operand.vmem [shape: bf16[32,128], index: 3, kind: input, shape index: {}]   ;;  %s733_s1 = inlined_call_operand.vmem [shape: f32[1,32], index: 1, kind: input, shape index: {}]   ;;  %s734_s2 = inlined_call_operand.vmem [shape: f32[1,32], index: 2, kind: input, shape index: {}]   ;;  %s735_s5 = inlined_call_operand.vmem [shape: bf16[128,32], index: 5, kind: input, shape index: {}]   ;;  %s736_s4 = inlined_call_operand.vmem [shape: f32[1,128], index: 4, kind: input, shape index: {}]   ;;  %s737_s6 = inlined_call_operand.vmem [shape: f32[1,32], index: 6, kind: input, shape index: {}]   ;;  %s738_s7 = inlined_call_operand.vmem [shape: f32[34,32], index: 7, kind: output, shape index: {}, may-alias: {0,7}]  }
   0x1   :  { %v574_v0 = vld [vmem:[%s731_s0] sm:$0xff]  ;;  %v579_v1 = vld [vmem:[%s731_s0 + $0x10] sm:$0xff]  ;;  %v584_v2 = vld [vmem:[%s731_s0 + $0x8] sm:$0xff]  ;;  %437 = vmatprep.subr.bf16.mxu0 %v529_v35  ;;  %441 = vmatprep.mubr.msk.bf16.mxu0 %vm530_vm2, %v529_v35 }
   0x2   :  { %v33_v3 = vsel %vm32_vm0, %v574_v0, 0.0  ;;  %v39_v4 = vsel %vm32_vm0, %v579_v1, 0.0  ;;  %v593_v5 = vld [vmem:[%s731_s0 + $0x18] sm:$0xff]  ;;  %v36_v6 = vsel %vm32_vm0, %v584_v2, 0.0  ;;  %v602_v8 = vld [vmem:[%s731_s0 + $0x20] sm:$0x3]  ;;  %481 = vmatprep.subr.bf16.mxu1 %v529_v35  ;;  %473 = vmatprep.mubr.msk.bf16.mxu1 %vm530_vm2, %v529_v35 }
   0x3   :  { %34 = vadd.xlane.f32.xlu0 %v33_v3  ;;  %40 = vadd.xlane.f32.xlu1 %v39_v4  ;;  %v42_v7 = vsel %vm32_vm0, %v593_v5, 0.0  ;;  %v46_v9 = vsel %vm45_vm1, %v602_v8, 0.0  ;;  %v499_v36 = vld [vmem:[%s732_s3 + $0x8] sm:$0xff]   ;;  %v500_v37 = vld [vmem:[%s732_s3] sm:$0xff]  }
   0x4   :  { %438 = vmatpush3.bf16.msra.mxu0 %v499_v36  ;;  %v404_v55 = vld [vmem:[%s733_s1] ss:$0 sm:$0xff] }
   0x5   :  { %439 = vmatprep.subr.bf16.mxu0 %v529_v35  ;;  %v405_v60 = vld [vmem:[%s734_s2] ss:$0 sm:$0xff] }
   0x7   :  { %37 = vadd.xlane.f32.xlu0 %v36_v6  ;;  %43 = vadd.xlane.f32.xlu1 %v42_v7 }
   0x8   :  { %440 = vmatpush3.bf16.msra.mxu0 %v500_v37 }
   0x9   :  { %453 = vmatprep.subr.bf16.mxu0 %v529_v35 }
   0xb   :  { %47 = vadd.xlane.f32.xlu0 %v46_v9 }
  0x8c   :  { %v35_v10 = vpop.xlane.xlu0 %34  ;;  %v41_v11 = vpop.xlane.xlu1 %40 }
  0x8d   :  { %v50_v12 = vmul.f32 0.03125, %v35_v10  ;;  %v52_v13 = vmul.f32 0.03125, %v41_v11 }
  0x8f   :  { %v55_v14 = vsub.f32 %v574_v0, %v50_v12  ;;  %v608_v15 = vsub.f32 %v579_v1, %v52_v13 }
  0x90   :  { %v38_v16 = vpop.xlane.xlu0 %37  ;;  %v44_v17 = vpop.xlane.xlu1 %43 }
  0x91   :  { %v51_v18 = vmul.f32 0.03125, %v38_v16  ;;  %v53_v19 = vmul.f32 0.03125, %v44_v17  ;;  %v60_v20 = vmul.f32 %v55_v14, %v55_v14  ;;  %v62_v21 = vmul.f32 %v608_v15, %v608_v15 }
  0x93   :  { %v56_v22 = vsub.f32 %v584_v2, %v51_v18  ;;  %v614_v23 = vsub.f32 %v593_v5, %v53_v19  ;;  %v65_v24 = vsel %vm32_vm0, %v60_v20, 0.0  ;;  %v71_v27 = vsel %vm32_vm0, %v62_v21, 0.0  ;;  %v501_v19 = vld [vmem:[%s735_s5 + $0x38] sm:$0xff]   ;;  %v502_v20 = vld [vmem:[%s735_s5 + $0x30] sm:$0xff]   ;;  %v503_v21 = vld [vmem:[%s735_s5 + $0x28] sm:$0xff]  }
  0x94   :  { %66 = vadd.xlane.f32.xlu1 %v65_v24  ;;  %v48_v25 = vpop.xlane.xlu0 %47  ;;  %489 = vmatpush3.bf16.msra.mxu1 %v501_v19  ;;  %v506_v24 = vld [vmem:[%s735_s5 + $0x10] sm:$0xff]  }
  0x95   :  { %v54_v26 = vmul.f32 0.03125, %v48_v25  ;;  %v61_v28 = vmul.f32 %v56_v22, %v56_v22  ;;  %v63_v29 = vmul.f32 %v614_v23, %v614_v23  ;;  %482 = vmatprep.subr.bf16.mxu1 %v529_v35  ;;  %v507_v25 = vld [vmem:[%s735_s5 + $0x8] sm:$0xff]  }
  0x97   :  { %v621_v30 = vsub.f32 %v602_v8, %v54_v26  ;;  %v68_v31 = vsel %vm32_vm0, %v61_v28, 0.0  ;;  %v74_v32 = vsel %vm32_vm0, %v63_v29, 0.0  ;;  %v508_v26 = vld [vmem:[%s735_s5] sm:$0xff]  }
  0x98   :  { %72 = vadd.xlane.f32.xlu1 %v71_v27  ;;  %69 = vadd.xlane.f32.xlu0 %v68_v31  ;;  %v406_v27 = vld [vmem:[%s736_s4] ss:$0 sm:$0xff] }
  0x99   :  { %v64_v33 = vmul.f32 %v621_v30, %v621_v30  ;;  %490 = vmatpush3.bf16.msra.mxu1 %v502_v20 }
  0x9a   :  { %483 = vmatprep.subr.bf16.mxu1 %v529_v35 }
  0x9b   :  { %v77_v34 = vsel %vm45_vm1, %v64_v33, 0.0 }
  0x9c   :  { %75 = vadd.xlane.f32.xlu0 %v74_v32  ;;  %78 = vadd.xlane.f32.xlu1 %v77_v34 }
  0x9d   :  { %491 = vmatpush3.bf16.msra.mxu1 %v503_v21 }
  0x9e   :  { %484 = vmatprep.subr.bf16.mxu1 %v529_v35 }
 0x11d   :  { %v67_v38 = vpop.xlane.xlu1 %66 }
 0x11e   :  { %v80_v39 = vmul.f32 0.03125, %v67_v38 }
 0x120   :  { %v85_v40 = vadd.f32 1e-06, %v80_v39 }
 0x121   :  { %v73_v41 = vpop.xlane.xlu1 %72  ;;  %v70_v42 = vpop.xlane.xlu0 %69 }
 0x122   :  { %509 = vrsqrt.f32 %v85_v40  ;;  %v82_v43 = vmul.f32 0.03125, %v73_v41  ;;  %v81_v44 = vmul.f32 0.03125, %v70_v42 }
 0x124   :  { %v86_v45 = vadd.f32 1e-06, %v81_v44  ;;  %v87_v46 = vadd.f32 1e-06, %v82_v43 }
 0x125   :  { %v79_v47 = vpop.xlane.xlu1 %78  ;;  %v76_v48 = vpop.xlane.xlu0 %75 }
 0x126   :  { %v83_v49 = vmul.f32 0.03125, %v76_v48  ;;  %511 = vrsqrt.f32 %v86_v45  ;;  %v84_v50 = vmul.f32 0.03125, %v79_v47 }
 0x127   :  { %513 = vrsqrt.f32 %v87_v46 }
 0x128   :  { %v88_v51 = vadd.f32 1e-06, %v83_v49  ;;  %v89_v52 = vadd.f32 1e-06, %v84_v50 }
 0x12a   :  { %515 = vrsqrt.f32 %v88_v51 }
 0x12b   :  { %517 = vrsqrt.f32 %v89_v52 }
 0x12f   :  { %v510_v53 = vpop.eup %509 }
 0x130   :  { %v95_v54 = vmul.f32 %v510_v53, %v55_v14 }
 0x132   :  { %v107_v58 = vmul.f32 %v404_v55, %v95_v54 }
 0x133   :  { %v512_v56 = vpop.eup %511 }
 0x134   :  { %v96_v57 = vmul.f32 %v512_v56, %v56_v22  ;;  %v514_v59 = vpop.eup %513  ;;  %v119_v63 = vadd.f32 %v405_v60, %v107_v58  ;;  %v504_v22 = vld [vmem:[%s735_s5 + $0x20] sm:$0xff]  }
 0x135   :  { %v97_v4 = vmul.f32 %v514_v59, %v608_v15  ;;  %492 = vmatpush3.bf16.msra.mxu1 %v504_v22 }
 0x136   :  { %v108_v61 = vmul.f32 %v404_v55, %v96_v57  ;;  %485 = vmatprep.subr.bf16.mxu1 %v529_v35 }
 0x137   :  { %v516_v62 = vpop.eup %515  ;;  %v109_v11 = vmul.f32 %v404_v55, %v97_v4 }
 0x138   :  { %v120_v3 = vadd.f32 %v405_v60, %v108_v61  ;;  %v98_v6 = vmul.f32 %v516_v62, %v614_v23  ;;  %v518_v10 = vpop.eup %517  ;;  %v505_v23 = vld [vmem:[%s735_s5 + $0x18] sm:$0xff]  }
 0x139   :  { %v99_v13 = vmul.f32 %v518_v10, %v621_v30  ;;  %v121_v14 = vadd.f32 %v405_v60, %v109_v11  ;;  %493 = vmatpush3.bf16.msra.mxu1 %v505_v23 }
 0x13a   :  { %v124_v7 = vpack.c.bf16 %v120_v3, %v119_v63  ;;  %v110_v9 = vmul.f32 %v404_v55, %v98_v6  ;;  %486 = vmatprep.subr.bf16.mxu1 %v529_v35 }
 0x13b   :  { %v111_v17 = vmul.f32 %v404_v55, %v99_v13 }
 0x13c   :  { %442 = vmatmul.mubr.msk.bf16.vlgmr.msra.gmra.mxu0 %vm32_vm0, %v124_v7  ;;  %v122_v12 = vadd.f32 %v405_v60, %v110_v9 }
 0x13d   :  { %445 = vmatprep.mubr.msk.bf16.mxu0 %vm530_vm2, %v529_v35  ;;  %v123_v15 = vadd.f32 %v405_v60, %v111_v17  ;;  %454 = vmatpush3.bf16.msra.mxu0 %v501_v19 }
 0x13e   :  { %v125_v16 = vpack.c.bf16 %v122_v12, %v121_v14  ;;  %455 = vmatprep.subr.bf16.mxu0 %v529_v35  ;;  %494 = vmatpush3.bf16.msra.mxu1 %v506_v24 }
 0x13f   :  { %v126_v18 = vpack.c.bf16 %v123_v15, %v123_v15  ;;  %487 = vmatprep.subr.bf16.mxu1 %v529_v35 }
 0x141   :  { %456 = vmatpush3.bf16.msra.mxu0 %v502_v20 }
 0x142   :  { %457 = vmatprep.subr.bf16.mxu0 %v529_v35  ;;  %495 = vmatpush3.bf16.msra.mxu1 %v507_v25 }
 0x143   :  { %488 = vmatprep.subr.bf16.mxu1 %v529_v35 }
 0x144   :  { %446 = vmatmul.mubr.msk.bf16.gmra.mxu0 %vm32_vm0, %v125_v16 }
 0x145   :  { %449 = vmatprep.mubr.msk.bf16.mxu0 %vm530_vm2, %v529_v35  ;;  %458 = vmatpush3.bf16.msra.mxu0 %v503_v21 }
 0x146   :  { %459 = vmatprep.subr.bf16.mxu0 %v529_v35  ;;  %496 = vmatpush3.bf16.msra.mxu1 %v508_v26 }
 0x149   :  { %460 = vmatpush3.bf16.msra.mxu0 %v504_v22 }
 0x14a   :  { %461 = vmatprep.subr.bf16.mxu0 %v529_v35 }
 0x14c   :  { %450 = vmatmul.mubr.msk.bf16.gmra.mxu0 %vm32_vm0, %v126_v18 }
 0x14d   :  { %469 = vmatprep.mubr.msk.bf16.mxu0 %vm530_vm2, %v529_v35  ;;  %462 = vmatpush3.bf16.msra.mxu0 %v505_v23 }
 0x14e   :  { %463 = vmatprep.subr.bf16.mxu0 %v529_v35 }
 0x151   :  { %464 = vmatpush3.bf16.msra.mxu0 %v506_v24 }
 0x152   :  { %465 = vmatprep.subr.bf16.mxu0 %v529_v35 }
 0x155   :  { %466 = vmatpush3.bf16.msra.mxu0 %v507_v25 }
 0x156   :  { %467 = vmatprep.subr.bf16.mxu0 %v529_v35 }
 0x159   :  { %468 = vmatpush3.bf16.msra.mxu0 %v508_v26 }
 0x1fc   :  { %v193_v28 = vpop.f32.mrf.mxu0 }
 0x1fd   :  { %v194_v29 = vadd.f32 %v406_v27, %v193_v28 }
 0x1fe   :  { %v443_v30 = vpop.f32.mrf.mxu0 }
 0x1ff   :  { %v220_v31 = vmul.f32 0.044715, %v194_v29  ;;  %v215_v16 = vmul.f32 0.5, %v194_v29 }
 0x200   :  { %v196_v32 = vpop.f32.mrf.mxu0 }
 0x201   :  { %v225_v33 = vmul.f32 %v220_v31, %v194_v29  ;;  %v197_v34 = vadd.f32 %v406_v27, %v196_v32 }
 0x202   :  { %v444_v36 = vpop.f32.mrf.mxu0 }
 0x203   :  { %v230_v37 = vmul.f32 %v225_v33, %v194_v29  ;;  %v221_v38 = vmul.f32 0.044715, %v197_v34  ;;  %v216_v17 = vmul.f32 0.5, %v197_v34  ;;  %v412_v36 = vld [vmem:[%s737_s6] ss:$0 sm:$0xff] }
 0x204   :  { %v201_v39 = vpop.f32.mrf.mxu0 }
 0x205   :  { %v235_v40 = vadd.f32 %v230_v37, %v194_v29  ;;  %v226_v41 = vmul.f32 %v221_v38, %v197_v34  ;;  %v202_v42 = vadd.f32 %v406_v27, %v201_v39 }
 0x206   :  { %v447_v43 = vpop.f32.mrf.mxu0 }
 0x207   :  { %v240_v44 = vmul.f32 0.7978846, %v235_v40  ;;  %v231_v45 = vmul.f32 %v226_v41, %v197_v34  ;;  %v222_v46 = vmul.f32 0.044715, %v202_v42  ;;  %v217_v24 = vmul.f32 0.5, %v202_v42 }
 0x208   :  { %v204_v47 = vpop.f32.mrf.mxu0 }
 0x209   :  { %519 = vtanh.f32 %v240_v44  ;;  %v236_v48 = vadd.f32 %v231_v45, %v197_v34  ;;  %v227_v49 = vmul.f32 %v222_v46, %v202_v42  ;;  %v205_v50 = vadd.f32 %v406_v27, %v204_v47 }
 0x20a   :  { %v448_v51 = vpop.f32.mrf.mxu0 }
 0x20b   :  { %v241_v52 = vmul.f32 0.7978846, %v236_v48  ;;  %v232_v53 = vmul.f32 %v227_v49, %v202_v42  ;;  %v223_v54 = vmul.f32 0.044715, %v205_v50  ;;  %v218_v25 = vmul.f32 0.5, %v205_v50 }
 0x20c   :  { %v209_v55 = vpop.f32.mrf.mxu0 }
 0x20d   :  { %521 = vtanh.f32 %v241_v52  ;;  %v228_v56 = vmul.f32 %v223_v54, %v205_v50  ;;  %v210_v57 = vadd.f32 %v406_v27, %v209_v55  ;;  %v237_v58 = vadd.f32 %v232_v53, %v202_v42 }
 0x20e   :  { %v451_v59 = vpop.f32.mrf.mxu0 }
 0x20f   :  { %v233_v60 = vmul.f32 %v228_v56, %v205_v50  ;;  %v224_v61 = vmul.f32 0.044715, %v210_v57  ;;  %v242_v62 = vmul.f32 0.7978846, %v237_v58  ;;  %v219_v33 = vmul.f32 0.5, %v210_v57 }
 0x210   :  { %v212_v63 = vpop.f32.mrf.mxu0 }
 0x211   :  { %v229_v3 = vmul.f32 %v224_v61, %v210_v57  ;;  %v238_v4 = vadd.f32 %v233_v60, %v205_v50  ;;  %523 = vtanh.f32 %v242_v62 }
 0x212   :  { %v452_v6 = vpop.f32.mrf.mxu0 }
 0x213   :  { %v243_v7 = vmul.f32 0.7978846, %v238_v4  ;;  %v234_v9 = vmul.f32 %v229_v3, %v210_v57 }
 0x215   :  { %525 = vtanh.f32 %v243_v7  ;;  %v239_v10 = vadd.f32 %v234_v9, %v210_v57 }
 0x216   :  { %v520_v11 = vpop.eup %519 }
 0x217   :  { %v244_v12 = vmul.f32 0.7978846, %v239_v10  ;;  %v250_v13 = vadd.f32 1.0, %v520_v11 }
 0x219   :  { %527 = vtanh.f32 %v244_v12  ;;  %v255_v18 = vmul.f32 %v250_v13, %v215_v16 }
 0x21a   :  { %v522_v14 = vpop.eup %521 }
 0x21b   :  { %v251_v15 = vadd.f32 1.0, %v522_v14 }
 0x21d   :  { %v256_v19 = vmul.f32 %v251_v15, %v216_v17 }
 0x21e   :  { %v524_v20 = vpop.eup %523 }
 0x21f   :  { %v260_v21 = vpack.c.bf16 %v256_v19, %v255_v18  ;;  %v252_v22 = vadd.f32 1.0, %v524_v20 }
 0x221   :  { %470 = vmatmul.mubr.bf16.vlgmr.msra.gmra.mxu0 %v260_v21  ;;  %v257_v27 = vmul.f32 %v252_v22, %v217_v24 }
 0x222   :  { %v526_v23 = vpop.eup %525 }
 0x223   :  { %v253_v26 = vadd.f32 1.0, %v526_v23 }
 0x225   :  { %v258_v28 = vmul.f32 %v253_v26, %v218_v25 }
 0x226   :  { %v528_v30 = vpop.eup %527 }
 0x227   :  { %v261_v31 = vpack.c.bf16 %v258_v28, %v257_v27  ;;  %v254_v32 = vadd.f32 1.0, %v528_v30 }
 0x229   :  { %474 = vmatmul.mubr.bf16.vlgmr.msra.gmra.mxu1 %v261_v31  ;;  %v259_v29 = vmul.f32 %v254_v32, %v219_v33 }
 0x22a   :  { %477 = vmatprep.mubr.msk.bf16.mxu1 %vm530_vm2, %v529_v35 }
 0x22b   :  { %v262_v34 = vpack.c.bf16 %v259_v29, %v259_v29 }
 0x231   :  { %478 = vmatmul.mubr.bf16.gmra.mxu1 %v262_v34 }
 0x2e1   :  { %v368_v37 = vpop.f32.mrf.mxu0 }
 0x2e2   :  { %v369_v38 = vadd.f32 %v412_v36, %v368_v37 }
 0x2e3   :  { %v471_v39 = vpop.f32.mrf.mxu0 }
 0x2e4   :  { %v390_v40 = vadd.f32 %v369_v38, %v574_v0 }
 0x2e5   :  { %v371_v41 = vpop.f32.mrf.mxu0 }
 0x2e6   :  { %395 = vst.msk [vmem:[%s738_s7] sm:$0xff] %vm32_vm0, %v390_v40  ;;  %v372_v42 = vadd.f32 %v412_v36, %v371_v41 }
 0x2e7   :  { %v472_v35 = vpop.f32.mrf.mxu0 }
 0x2e8   :  { %v391_v43 = vadd.f32 %v372_v42, %v584_v2 }
 0x2e9   :  { %v376_v44 = vpop.f32.mrf.mxu1 }
 0x2ea   :  { %396 = vst.msk [vmem:[%s738_s7 + $0x8] sm:$0xff] %vm32_vm0, %v391_v43  ;;  %v377_v45 = vadd.f32 %v412_v36, %v376_v44 }
 0x2eb   :  { %v475_v46 = vpop.f32.mrf.mxu1 }
 0x2ec   :  { %v392_v0 = vadd.f32 %v377_v45, %v579_v1 }
 0x2ed   :  { %v379_v47 = vpop.f32.mrf.mxu1 }
 0x2ee   :  { %397 = vst.msk [vmem:[%s738_s7 + $0x10] sm:$0xff] %vm32_vm0, %v392_v0  ;;  %v380_v48 = vadd.f32 %v412_v36, %v379_v47 }
 0x2ef   :  { %v476_v49 = vpop.f32.mrf.mxu1 }
 0x2f0   :  { %v393_v2 = vadd.f32 %v380_v48, %v593_v5 }
 0x2f1   :  { %v384_v50 = vpop.f32.mrf.mxu1 }
 0x2f2   :  { %398 = vst.msk [vmem:[%s738_s7 + $0x18] sm:$0xff] %vm32_vm0, %v393_v2  ;;  %v385_v51 = vadd.f32 %v412_v36, %v384_v50 }
 0x2f3   :  { %v479_v52 = vpop.f32.mrf.mxu1 }
 0x2f4   :  { %v394_v1 = vadd.f32 %v385_v51, %v602_v8 }
 0x2f5   :  { %v387_v53 = vpop.f32.mrf.mxu1 }
 0x2f6   :  { %399 = vst.msk [vmem:[%s738_s7 + $0x20] sm:$0x3] %vm45_vm1, %v394_v1 }
 0x2f7   :  { %v480_v54 = vpop.f32.mrf.mxu1 }

</bundles_post_ra>
